<compile_context>
chip_gen: v7x
topology: tpu7x:2x2x1
jax: 0.10.0
libtpu: 0.0.40
codegen_flags: <defaults>
</compile_context>

<pallas_src>
import jax
import jax.numpy as jnp
from jax.experimental import pallas as pl
from jax.experimental.pallas import tpu as pltpu

BN_EPS = 1e-5
LANE = 128


def _round_up(x, m):
    return (x + m - 1) // m * m


# ----------------------------------------------------------------------------
# Pallas kernel: conv1(3x3,s)+BN1+ReLU -> conv2(3x3,1)+BN2 -> +skip -> ReLU
# ----------------------------------------------------------------------------
def make_block_kernel(Ho, Wo, Cin_p, Cout_p, stride, has_proj):
    HW = Ho * Wo
    s = stride
    bf16 = jnp.bfloat16

    def kernel(*refs):
        if has_proj:
            (xps_ref, w1_ref, w2_ref, wsk_ref,
             s1_ref, b1_ref, s2_ref, b2_ref, ssk_ref, bsk_ref,
             out_ref, ypad_ref) = refs
        else:
            (xps_ref, w1_ref, w2_ref,
             s1_ref, b1_ref, s2_ref, b2_ref,
             out_ref, ypad_ref) = refs

        f32 = jnp.float32

        # ---- conv1: 9 shifted windows taken directly from the phase-split
        #      padded input tile (VMEM), bf16 MXU matmuls, f32 accumulate -----
        acc1 = jnp.zeros((HW, Cout_p), f32)
        for kh in range(3):
            for kw in range(3):
                ph = (kh % s) * s + (kw % s)
                ro, co = kh // s, kw // s
                patch = xps_ref[ph, ro:ro + Ho, co:co + Wo, :]
                patch = patch.reshape(HW, Cin_p).astype(bf16)
                acc1 = acc1 + jnp.dot(patch, w1_ref[kh * 3 + kw],
                                      preferred_element_type=f32)
        y1 = jnp.maximum(acc1 * s1_ref[...] + b1_ref[...], 0.0)

        # ---- conv2 (3x3, stride 1, pad 1): zero only the 1-px border of the
        #      persistent VMEM scratch; interior is fully overwritten ---------
        zrow = jnp.zeros((1, Wo + 2, Cout_p), f32)
        zcol = jnp.zeros((Ho + 2, 1, Cout_p), f32)
        ypad_ref[0:1, :, :] = zrow
        ypad_ref[Ho + 1:Ho + 2, :, :] = zrow
        ypad_ref[:, 0:1, :] = zcol
        ypad_ref[:, Wo + 1:Wo + 2, :] = zcol
        ypad_ref[1:Ho + 1, 1:Wo + 1, :] = y1.reshape(Ho, Wo, Cout_p)

        acc2 = jnp.zeros((HW, Cout_p), f32)
        for kh in range(3):
            for kw in range(3):
                patch = ypad_ref[kh:kh + Ho, kw:kw + Wo, :]
                patch = patch.reshape(HW, Cout_p).astype(bf16)
                acc2 = acc2 + jnp.dot(patch, w2_ref[kh * 3 + kw],
                                      preferred_element_type=f32)
        y2 = acc2 * s2_ref[...] + b2_ref[...]

        # ---- skip path: identity, or 1x1 conv (matmul) + folded BN, both
        #      read from the same padded input tile (no extra HBM input) ------
        ph_sk = (1 % s) * s + (1 % s)
        off = 1 // s
        xsk = xps_ref[ph_sk, off:off + Ho, off:off + Wo, :].reshape(HW, Cin_p)
        if has_proj:
            sk = jnp.dot(xsk.astype(bf16), wsk_ref[...],
                         preferred_element_type=f32)
            sk = sk * ssk_ref[...] + bsk_ref[...]
        else:
            sk = xsk  # identity: Cin_p == Cout_p, already f32

        out_ref[0] = jnp.maximum(y2 + sk, 0.0).astype(out_ref.dtype)

    return kernel


# ----------------------------------------------------------------------------
# Wrapper: layout plumbing (padding, phase split, BN folding) + pallas_call
# ----------------------------------------------------------------------------
def _fold_bn(bn, Cout_p):
    gamma, beta, mean, var = bn
    scale = gamma / jnp.sqrt(var + BN_EPS)
    bias = beta - mean * scale
    pad = Cout_p - scale.shape[0]
    # Padded channels get scale=0 / bias=0 so they stay exactly zero.
    scale = jnp.pad(scale, (0, pad)).reshape(1, Cout_p)
    bias = jnp.pad(bias, (0, pad)).reshape(1, Cout_p)
    return scale, bias


def _phase_split(x_nhwc, stride, Cin_p):
    """Pad spatially by 1, pad channels to Cin_p, split into stride^2 phases.

    Total bytes == one padded copy of the input (no 9x tap duplication); every
    conv1 tap and the strided skip read become unit-stride slices in-kernel.
    """
    N, H, W, Cin = x_nhwc.shape
    s = stride
    xp = jnp.pad(x_nhwc, ((0, 0), (1, 1), (1, 1), (0, Cin_p - Cin)))
    Hpad, Wpad = H + 2, W + 2
    Hph = (Hpad + s - 1) // s
    Wph = (Wpad + s - 1) // s
    xp = jnp.pad(xp, ((0, 0), (0, Hph * s - Hpad), (0, Wph * s - Wpad), (0, 0)))
    xps = xp.reshape(N, Hph, s, Wph, s, Cin_p)
    xps = xps.transpose(0, 2, 4, 1, 3, 5)           # (N, s, s, Hph, Wph, C)
    return xps.reshape(N * s * s, Hph, Wph, Cin_p)  # phases flattened into dim0


def default_block_forward(x_nchw, params, stride):
    x_nhwc = jnp.transpose(x_nchw, (0, 2, 3, 1))
    N, H, W, Cin = x_nhwc.shape
    Cout = params["w1"].shape[-1]
    has_proj = (stride != 1) or (Cin != Cout)
    s = stride

    Ho = (H + 2 - 3) // s + 1
    Wo = (W + 2 - 3) // s + 1
    HW = Ho * Wo

    Cin_p = _round_up(Cin, LANE)
    Cout_p = _round_up(Cout, LANE)
    S2 = s * s

    xps = _phase_split(x_nhwc, s, Cin_p)            # f32, one copy of input
    Hph, Wph = xps.shape[1], xps.shape[2]

    w1 = jnp.pad(params["w1"],
                 ((0, 0), (0, 0), (0, Cin_p - Cin), (0, Cout_p - Cout)))
    w1 = w1.reshape(9, Cin_p, Cout_p).astype(jnp.bfloat16)
    w2 = jnp.pad(params["w2"],
                 ((0, 0), (0, 0), (0, Cout_p - Cout), (0, Cout_p - Cout)))
    w2 = w2.reshape(9, Cout_p, Cout_p).astype(jnp.bfloat16)
    s1, b1 = _fold_bn(params["bn1"], Cout_p)
    s2, b2 = _fold_bn(params["bn2"], Cout_p)

    inputs = [xps, w1, w2]
    in_specs = [
        pl.BlockSpec((S2, Hph, Wph, Cin_p), lambda n: (n, 0, 0, 0)),
        pl.BlockSpec((9, Cin_p, Cout_p), lambda n: (0, 0, 0)),
        pl.BlockSpec((9, Cout_p, Cout_p), lambda n: (0, 0, 0)),
    ]
    if has_proj:
        wsk = jnp.pad(params["wskip"].reshape(Cin, Cout),
                      ((0, Cin_p - Cin), (0, Cout_p - Cout)))
        inputs.append(wsk.astype(jnp.bfloat16))
        in_specs.append(pl.BlockSpec((Cin_p, Cout_p), lambda n: (0, 0)))

    vec_spec = pl.BlockSpec((1, Cout_p), lambda n: (0, 0))
    inputs += [s1, b1, s2, b2]
    in_specs += [vec_spec] * 4
    if has_proj:
        ssk, bsk = _fold_bn(params["bnskip"], Cout_p)
        inputs += [ssk, bsk]
        in_specs += [vec_spec] * 2

    kernel = make_block_kernel(Ho, Wo, Cin_p, Cout_p, s, has_proj)

    out_flat = pl.pallas_call(
        kernel,
        out_shape=jax.ShapeDtypeStruct((N, HW, Cout_p), jnp.float32),
        grid=(N,),
        in_specs=in_specs,
        out_specs=pl.BlockSpec((1, HW, Cout_p), lambda n: (n, 0, 0)),
        scratch_shapes=[pltpu.VMEM((Ho + 2, Wo + 2, Cout_p), jnp.float32)],
        compiler_params=pltpu.CompilerParams(
            dimension_semantics=("parallel",),
            vmem_limit_bytes=32 * 1024 * 1024),
    )(*inputs)

    out_nhwc = out_flat.reshape(N, Ho, Wo, Cout_p)[..., :Cout]
    return jnp.transpose(out_nhwc, (0, 3, 1, 2))


# ----------------------------------------------------------------------------
# Deterministic parameter init + pure-JAX reference (lax conv) for checking
# ----------------------------------------------------------------------------
def init_params(key, Cin, Cout, has_proj):
    ks = jax.random.split(key, 12)

    def bn_params(k0, k1, k2, k3):
        gamma = 1.0 + 0.1 * jax.random.normal(k0, (Cout,), jnp.float32)
        beta = 0.1 * jax.random.normal(k1, (Cout,), jnp.float32)
        mean = 0.1 * jax.random.normal(k2, (Cout,), jnp.float32)
        var = 0.5 + jax.random.uniform(k3, (Cout,), jnp.float32)
        return (gamma, beta, mean, var)

    params = {
        "w1": 0.1 * jax.random.normal(ks[0], (3, 3, Cin, Cout), jnp.float32),
        "w2": 0.1 * jax.random.normal(ks[1], (3, 3, Cout, Cout), jnp.float32),
        "bn1": bn_params(ks[2], ks[3], ks[4], ks[5]),
        "bn2": bn_params(ks[6], ks[7], ks[8], ks[9]),
    }
    if has_proj:
        kk = jax.random.split(ks[10], 5)
        params["wskip"] = 0.1 * jax.random.normal(kk[0], (1, 1, Cin, Cout),
                                                  jnp.float32)
        params["bnskip"] = bn_params(kk[1], kk[2], kk[3], kk[4])
    return params


def reference_block(x_nchw, params, stride):
    x = jnp.transpose(x_nchw, (0, 2, 3, 1))
    Cin = x.shape[-1]
    Cout = params["w1"].shape[-1]
    has_proj = (stride != 1) or (Cin != Cout)

    def conv(a, w, s, pad):
        return jax.lax.conv_general_dilated(
            a, w, (s, s), pad, dimension_numbers=("NHWC", "HWIO", "NHWC"))

    def bn(a, p):
        g, b, m, v = p
        return (a - m) * (g / jnp.sqrt(v + BN_EPS)) + b

    y = jax.nn.relu(bn(conv(x, params["w1"], stride, ((1, 1), (1, 1))),
                       params["bn1"]))
    y = bn(conv(y, params["w2"], 1, ((1, 1), (1, 1))), params["bn2"])
    if has_proj:
        sk = bn(conv(x, params["wskip"], stride, ((0, 0), (0, 0))),
                params["bnskip"])
    else:
        sk = x
    y = jax.nn.relu(y + sk)
    return jnp.transpose(y, (0, 3, 1, 2))


def _run_config(key, N, Cin, Cout, H, W, stride):
    kx, kp = jax.random.split(key)
    x = jax.random.normal(kx, (N, Cin, H, W), jnp.float32)   # NCHW like PyTorch
    has_proj = (stride != 1) or (Cin != Cout)
    params = init_params(kp, Cin, Cout, has_proj)

    out = default_block_forward(x, params, stride)
    out = jax.block_until_ready(out)

    ref = reference_block(x, params, stride)
    assert out.shape == ref.shape, (out.shape, ref.shape)
    # bf16 MXU operands (f32 accumulate) -> relaxed but bug-catching tolerance.
    assert jnp.allclose(out, ref, atol=5e-2, rtol=5e-2), (
        float(jnp.max(jnp.abs(out - ref))))
    return out


if __name__ == "__main__":
    key = jax.random.PRNGKey(0)
    k1, k2 = jax.random.split(key)

    # Config A: projection skip (stride=2, Cin=4 -> Cout=8), x NCHW (2,4,16,16)
    _run_config(k1, N=2, Cin=4, Cout=8, H=16, W=16, stride=2)

    # Config B: identity skip (stride=1, Cin=Cout=8), x NCHW (2,8,16,16)
    _run_config(k2, N=2, Cin=8, Cout=8, H=16, W=16, stride=1)

    print("KERNEL_OK")
</pallas_src>

<mosaic_0001>
module attributes {stable_mosaic.version = 11 : i64} {
  func.func @kernel(%arg0: i32, %arg1: memref<4x9x9x128xf32, #tpu.memory_space<vmem>>, %arg2: memref<9x128x128xbf16, #tpu.memory_space<vmem>>, %arg3: memref<9x128x128xbf16, #tpu.memory_space<vmem>>, %arg4: memref<128x128xbf16, #tpu.memory_space<vmem>>, %arg5: memref<1x128xf32, #tpu.memory_space<vmem>>, %arg6: memref<1x128xf32, #tpu.memory_space<vmem>>, %arg7: memref<1x128xf32, #tpu.memory_space<vmem>>, %arg8: memref<1x128xf32, #tpu.memory_space<vmem>>, %arg9: memref<1x128xf32, #tpu.memory_space<vmem>>, %arg10: memref<1x128xf32, #tpu.memory_space<vmem>>, %arg11: memref<1x64x128xf32, #tpu.memory_space<vmem>>, %arg12: memref<10x10x128xf32, #tpu.memory_space<vmem>>) attributes {dimension_semantics = [#tpu.dimension_semantics<parallel>], iteration_bounds = array<i64: 2>, scalar_prefetch = 0 : i64, scratch_operands = 1 : i64, tpu.core_type = #tpu.core_type<tc>, window_params = [{transform_indices = @transform_0, window_bounds = array<i64: 4, 9, 9, 128>}, {pipeline_mode = #tpu.pipeline_mode<synchronous>, transform_indices = @transform_1, window_bounds = array<i64: 9, 128, 128>}, {pipeline_mode = #tpu.pipeline_mode<synchronous>, transform_indices = @transform_2, window_bounds = array<i64: 9, 128, 128>}, {pipeline_mode = #tpu.pipeline_mode<synchronous>, transform_indices = @transform_3, window_bounds = array<i64: 128, 128>}, {pipeline_mode = #tpu.pipeline_mode<synchronous>, transform_indices = @transform_4, window_bounds = array<i64: 1, 128>}, {pipeline_mode = #tpu.pipeline_mode<synchronous>, transform_indices = @transform_5, window_bounds = array<i64: 1, 128>}, {pipeline_mode = #tpu.pipeline_mode<synchronous>, transform_indices = @transform_6, window_bounds = array<i64: 1, 128>}, {pipeline_mode = #tpu.pipeline_mode<synchronous>, transform_indices = @transform_7, window_bounds = array<i64: 1, 128>}, {pipeline_mode = #tpu.pipeline_mode<synchronous>, transform_indices = @transform_8, window_bounds = array<i64: 1, 128>}, {pipeline_mode = #tpu.pipeline_mode<synchronous>, transform_indices = @transform_9, window_bounds = array<i64: 1, 128>}, {transform_indices = @transform_10, window_bounds = array<i64: 1, 64, 128>}]} {
    %cst = arith.constant 0.000000e+00 : f32
    %0 = vector.broadcast %cst : f32 to vector<64x128xf32>
    %c0 = arith.constant 0 : index
    %c0_0 = arith.constant 0 : index
    %c0_1 = arith.constant 0 : index
    %c0_2 = arith.constant 0 : index
    %1 = vector.load %arg1[%c0, %c0_0, %c0_1, %c0_2] : memref<4x9x9x128xf32, #tpu.memory_space<vmem>>, vector<1x8x8x128xf32>
    %2 = vector.shape_cast %1 : vector<1x8x8x128xf32> to vector<8x8x128xf32>
    %3 = vector.shape_cast %2 : vector<8x8x128xf32> to vector<64x128xf32>
    %4 = arith.truncf %3 : vector<64x128xf32> to vector<64x128xbf16>
    %c0_3 = arith.constant 0 : index
    %c0_4 = arith.constant 0 : index
    %c0_5 = arith.constant 0 : index
    %5 = vector.load %arg2[%c0_3, %c0_4, %c0_5] : memref<9x128x128xbf16, #tpu.memory_space<vmem>>, vector<1x128x128xbf16>
    %6 = vector.shape_cast %5 : vector<1x128x128xbf16> to vector<128x128xbf16>
    %cst_6 = arith.constant dense<0.000000e+00> : vector<64x128xf32>
    %7 = tpu.matmul %4, %6, %cst_6 {dimension_numbers = #tpu.dot_dimension_numbers<[1], [0], [0], [1], [0, 0, 1, 1], [], []>} : vector<64x128xbf16>, vector<128x128xbf16>, vector<64x128xf32> -> vector<64x128xf32>
    %8 = arith.addf %0, %7 : vector<64x128xf32>
    %c1 = arith.constant 1 : index
    %c0_7 = arith.constant 0 : index
    %c0_8 = arith.constant 0 : index
    %c0_9 = arith.constant 0 : index
    %9 = vector.load %arg1[%c1, %c0_7, %c0_8, %c0_9] : memref<4x9x9x128xf32, #tpu.memory_space<vmem>>, vector<1x8x8x128xf32>
    %10 = vector.shape_cast %9 : vector<1x8x8x128xf32> to vector<8x8x128xf32>
    %11 = vector.shape_cast %10 : vector<8x8x128xf32> to vector<64x128xf32>
    %12 = arith.truncf %11 : vector<64x128xf32> to vector<64x128xbf16>
    %c1_10 = arith.constant 1 : index
    %c0_11 = arith.constant 0 : index
    %c0_12 = arith.constant 0 : index
    %13 = vector.load %arg2[%c1_10, %c0_11, %c0_12] : memref<9x128x128xbf16, #tpu.memory_space<vmem>>, vector<1x128x128xbf16>
    %14 = vector.shape_cast %13 : vector<1x128x128xbf16> to vector<128x128xbf16>
    %cst_13 = arith.constant dense<0.000000e+00> : vector<64x128xf32>
    %15 = tpu.matmul %12, %14, %cst_13 {dimension_numbers = #tpu.dot_dimension_numbers<[1], [0], [0], [1], [0, 0, 1, 1], [], []>} : vector<64x128xbf16>, vector<128x128xbf16>, vector<64x128xf32> -> vector<64x128xf32>
    %16 = arith.addf %8, %15 : vector<64x128xf32>
    %c0_14 = arith.constant 0 : index
    %c0_15 = arith.constant 0 : index
    %c1_16 = arith.constant 1 : index
    %c0_17 = arith.constant 0 : index
    %17 = vector.load %arg1[%c0_14, %c0_15, %c1_16, %c0_17] : memref<4x9x9x128xf32, #tpu.memory_space<vmem>>, vector<1x8x8x128xf32>
    %18 = vector.shape_cast %17 : vector<1x8x8x128xf32> to vector<8x8x128xf32>
    %19 = vector.shape_cast %18 : vector<8x8x128xf32> to vector<64x128xf32>
    %20 = arith.truncf %19 : vector<64x128xf32> to vector<64x128xbf16>
    %c2 = arith.constant 2 : index
    %c0_18 = arith.constant 0 : index
    %c0_19 = arith.constant 0 : index
    %21 = vector.load %arg2[%c2, %c0_18, %c0_19] : memref<9x128x128xbf16, #tpu.memory_space<vmem>>, vector<1x128x128xbf16>
    %22 = vector.shape_cast %21 : vector<1x128x128xbf16> to vector<128x128xbf16>
    %cst_20 = arith.constant dense<0.000000e+00> : vector<64x128xf32>
    %23 = tpu.matmul %20, %22, %cst_20 {dimension_numbers = #tpu.dot_dimension_numbers<[1], [0], [0], [1], [0, 0, 1, 1], [], []>} : vector<64x128xbf16>, vector<128x128xbf16>, vector<64x128xf32> -> vector<64x128xf32>
    %24 = arith.addf %16, %23 : vector<64x128xf32>
    %c2_21 = arith.constant 2 : index
    %c0_22 = arith.constant 0 : index
    %c0_23 = arith.constant 0 : index
    %c0_24 = arith.constant 0 : index
    %25 = vector.load %arg1[%c2_21, %c0_22, %c0_23, %c0_24] : memref<4x9x9x128xf32, #tpu.memory_space<vmem>>, vector<1x8x8x128xf32>
    %26 = vector.shape_cast %25 : vector<1x8x8x128xf32> to vector<8x8x128xf32>
    %27 = vector.shape_cast %26 : vector<8x8x128xf32> to vector<64x128xf32>
    %28 = arith.truncf %27 : vector<64x128xf32> to vector<64x128xbf16>
    %c3 = arith.constant 3 : index
    %c0_25 = arith.constant 0 : index
    %c0_26 = arith.constant 0 : index
    %29 = vector.load %arg2[%c3, %c0_25, %c0_26] : memref<9x128x128xbf16, #tpu.memory_space<vmem>>, vector<1x128x128xbf16>
    %30 = vector.shape_cast %29 : vector<1x128x128xbf16> to vector<128x128xbf16>
    %cst_27 = arith.constant dense<0.000000e+00> : vector<64x128xf32>
    %31 = tpu.matmul %28, %30, %cst_27 {dimension_numbers = #tpu.dot_dimension_numbers<[1], [0], [0], [1], [0, 0, 1, 1], [], []>} : vector<64x128xbf16>, vector<128x128xbf16>, vector<64x128xf32> -> vector<64x128xf32>
    %32 = arith.addf %24, %31 : vector<64x128xf32>
    %c3_28 = arith.constant 3 : index
    %c0_29 = arith.constant 0 : index
    %c0_30 = arith.constant 0 : index
    %c0_31 = arith.constant 0 : index
    %33 = vector.load %arg1[%c3_28, %c0_29, %c0_30, %c0_31] : memref<4x9x9x128xf32, #tpu.memory_space<vmem>>, vector<1x8x8x128xf32>
    %34 = vector.shape_cast %33 : vector<1x8x8x128xf32> to vector<8x8x128xf32>
    %35 = vector.shape_cast %34 : vector<8x8x128xf32> to vector<64x128xf32>
    %36 = arith.truncf %35 : vector<64x128xf32> to vector<64x128xbf16>
    %c4 = arith.constant 4 : index
    %c0_32 = arith.constant 0 : index
    %c0_33 = arith.constant 0 : index
    %37 = vector.load %arg2[%c4, %c0_32, %c0_33] : memref<9x128x128xbf16, #tpu.memory_space<vmem>>, vector<1x128x128xbf16>
    %38 = vector.shape_cast %37 : vector<1x128x128xbf16> to vector<128x128xbf16>
    %cst_34 = arith.constant dense<0.000000e+00> : vector<64x128xf32>
    %39 = tpu.matmul %36, %38, %cst_34 {dimension_numbers = #tpu.dot_dimension_numbers<[1], [0], [0], [1], [0, 0, 1, 1], [], []>} : vector<64x128xbf16>, vector<128x128xbf16>, vector<64x128xf32> -> vector<64x128xf32>
    %40 = arith.addf %32, %39 : vector<64x128xf32>
    %c2_35 = arith.constant 2 : index
    %c0_36 = arith.constant 0 : index
    %c1_37 = arith.constant 1 : index
    %c0_38 = arith.constant 0 : index
    %41 = vector.load %arg1[%c2_35, %c0_36, %c1_37, %c0_38] : memref<4x9x9x128xf32, #tpu.memory_space<vmem>>, vector<1x8x8x128xf32>
    %42 = vector.shape_cast %41 : vector<1x8x8x128xf32> to vector<8x8x128xf32>
    %43 = vector.shape_cast %42 : vector<8x8x128xf32> to vector<64x128xf32>
    %44 = arith.truncf %43 : vector<64x128xf32> to vector<64x128xbf16>
    %c5 = arith.constant 5 : index
    %c0_39 = arith.constant 0 : index
    %c0_40 = arith.constant 0 : index
    %45 = vector.load %arg2[%c5, %c0_39, %c0_40] : memref<9x128x128xbf16, #tpu.memory_space<vmem>>, vector<1x128x128xbf16>
    %46 = vector.shape_cast %45 : vector<1x128x128xbf16> to vector<128x128xbf16>
    %cst_41 = arith.constant dense<0.000000e+00> : vector<64x128xf32>
    %47 = tpu.matmul %44, %46, %cst_41 {dimension_numbers = #tpu.dot_dimension_numbers<[1], [0], [0], [1], [0, 0, 1, 1], [], []>} : vector<64x128xbf16>, vector<128x128xbf16>, vector<64x128xf32> -> vector<64x128xf32>
    %48 = arith.addf %40, %47 : vector<64x128xf32>
    %c0_42 = arith.constant 0 : index
    %c1_43 = arith.constant 1 : index
    %c0_44 = arith.constant 0 : index
    %c0_45 = arith.constant 0 : index
    %49 = vector.load %arg1[%c0_42, %c1_43, %c0_44, %c0_45] : memref<4x9x9x128xf32, #tpu.memory_space<vmem>>, vector<1x8x8x128xf32>
    %50 = vector.shape_cast %49 : vector<1x8x8x128xf32> to vector<8x8x128xf32>
    %51 = vector.shape_cast %50 : vector<8x8x128xf32> to vector<64x128xf32>
    %52 = arith.truncf %51 : vector<64x128xf32> to vector<64x128xbf16>
    %c6 = arith.constant 6 : index
    %c0_46 = arith.constant 0 : index
    %c0_47 = arith.constant 0 : index
    %53 = vector.load %arg2[%c6, %c0_46, %c0_47] : memref<9x128x128xbf16, #tpu.memory_space<vmem>>, vector<1x128x128xbf16>
    %54 = vector.shape_cast %53 : vector<1x128x128xbf16> to vector<128x128xbf16>
    %cst_48 = arith.constant dense<0.000000e+00> : vector<64x128xf32>
    %55 = tpu.matmul %52, %54, %cst_48 {dimension_numbers = #tpu.dot_dimension_numbers<[1], [0], [0], [1], [0, 0, 1, 1], [], []>} : vector<64x128xbf16>, vector<128x128xbf16>, vector<64x128xf32> -> vector<64x128xf32>
    %56 = arith.addf %48, %55 : vector<64x128xf32>
    %c1_49 = arith.constant 1 : index
    %c1_50 = arith.constant 1 : index
    %c0_51 = arith.constant 0 : index
    %c0_52 = arith.constant 0 : index
    %57 = vector.load %arg1[%c1_49, %c1_50, %c0_51, %c0_52] : memref<4x9x9x128xf32, #tpu.memory_space<vmem>>, vector<1x8x8x128xf32>
    %58 = vector.shape_cast %57 : vector<1x8x8x128xf32> to vector<8x8x128xf32>
    %59 = vector.shape_cast %58 : vector<8x8x128xf32> to vector<64x128xf32>
    %60 = arith.truncf %59 : vector<64x128xf32> to vector<64x128xbf16>
    %c7 = arith.constant 7 : index
    %c0_53 = arith.constant 0 : index
    %c0_54 = arith.constant 0 : index
    %61 = vector.load %arg2[%c7, %c0_53, %c0_54] : memref<9x128x128xbf16, #tpu.memory_space<vmem>>, vector<1x128x128xbf16>
    %62 = vector.shape_cast %61 : vector<1x128x128xbf16> to vector<128x128xbf16>
    %cst_55 = arith.constant dense<0.000000e+00> : vector<64x128xf32>
    %63 = tpu.matmul %60, %62, %cst_55 {dimension_numbers = #tpu.dot_dimension_numbers<[1], [0], [0], [1], [0, 0, 1, 1], [], []>} : vector<64x128xbf16>, vector<128x128xbf16>, vector<64x128xf32> -> vector<64x128xf32>
    %64 = arith.addf %56, %63 : vector<64x128xf32>
    %c0_56 = arith.constant 0 : index
    %c1_57 = arith.constant 1 : index
    %c1_58 = arith.constant 1 : index
    %c0_59 = arith.constant 0 : index
    %65 = vector.load %arg1[%c0_56, %c1_57, %c1_58, %c0_59] : memref<4x9x9x128xf32, #tpu.memory_space<vmem>>, vector<1x8x8x128xf32>
    %66 = vector.shape_cast %65 : vector<1x8x8x128xf32> to vector<8x8x128xf32>
    %67 = vector.shape_cast %66 : vector<8x8x128xf32> to vector<64x128xf32>
    %68 = arith.truncf %67 : vector<64x128xf32> to vector<64x128xbf16>
    %c8 = arith.constant 8 : index
    %c0_60 = arith.constant 0 : index
    %c0_61 = arith.constant 0 : index
    %69 = vector.load %arg2[%c8, %c0_60, %c0_61] : memref<9x128x128xbf16, #tpu.memory_space<vmem>>, vector<1x128x128xbf16>
    %70 = vector.shape_cast %69 : vector<1x128x128xbf16> to vector<128x128xbf16>
    %cst_62 = arith.constant dense<0.000000e+00> : vector<64x128xf32>
    %71 = tpu.matmul %68, %70, %cst_62 {dimension_numbers = #tpu.dot_dimension_numbers<[1], [0], [0], [1], [0, 0, 1, 1], [], []>} : vector<64x128xbf16>, vector<128x128xbf16>, vector<64x128xf32> -> vector<64x128xf32>
    %72 = arith.addf %64, %71 : vector<64x128xf32>
    %c0_63 = arith.constant 0 : index
    %c0_64 = arith.constant 0 : index
    %73 = vector.load %arg5[%c0_63, %c0_64] : memref<1x128xf32, #tpu.memory_space<vmem>>, vector<1x128xf32>
    %74 = vector.broadcast %73 : vector<1x128xf32> to vector<64x128xf32>
    %75 = arith.mulf %72, %74 : vector<64x128xf32>
    %c0_65 = arith.constant 0 : index
    %c0_66 = arith.constant 0 : index
    %76 = vector.load %arg6[%c0_65, %c0_66] : memref<1x128xf32, #tpu.memory_space<vmem>>, vector<1x128xf32>
    %77 = vector.broadcast %76 : vector<1x128xf32> to vector<64x128xf32>
    %78 = arith.addf %75, %77 : vector<64x128xf32>
    %cst_67 = arith.constant 0.000000e+00 : f32
    %79 = vector.broadcast %cst_67 : f32 to vector<64x128xf32>
    %80 = arith.maximumf %78, %79 : vector<64x128xf32>
    %cst_68 = arith.constant 0.000000e+00 : f32
    %81 = vector.broadcast %cst_68 : f32 to vector<1x10x128xf32>
    %cst_69 = arith.constant 0.000000e+00 : f32
    %82 = vector.broadcast %cst_69 : f32 to vector<10x1x128xf32>
    %c0_70 = arith.constant 0 : index
    %c0_71 = arith.constant 0 : index
    %c0_72 = arith.constant 0 : index
    %83 = vector.load %arg12[%c0_70, %c0_71, %c0_72] : memref<10x10x128xf32, #tpu.memory_space<vmem>>, vector<1x10x128xf32>
    tpu.vector_store %arg12[%c0_70, %c0_71, %c0_72], %81 {strides = array<i32>} : memref<10x10x128xf32, #tpu.memory_space<vmem>>, vector<1x10x128xf32>,
    %c9 = arith.constant 9 : index
    %c0_73 = arith.constant 0 : index
    %c0_74 = arith.constant 0 : index
    %84 = vector.load %arg12[%c9, %c0_73, %c0_74] : memref<10x10x128xf32, #tpu.memory_space<vmem>>, vector<1x10x128xf32>
    tpu.vector_store %arg12[%c9, %c0_73, %c0_74], %81 {strides = array<i32>} : memref<10x10x128xf32, #tpu.memory_space<vmem>>, vector<1x10x128xf32>,
    %c0_75 = arith.constant 0 : index
    %c0_76 = arith.constant 0 : index
    %c0_77 = arith.constant 0 : index
    %85 = vector.load %arg12[%c0_75, %c0_76, %c0_77] : memref<10x10x128xf32, #tpu.memory_space<vmem>>, vector<10x1x128xf32>
    tpu.vector_store %arg12[%c0_75, %c0_76, %c0_77], %82 {strides = array<i32>} : memref<10x10x128xf32, #tpu.memory_space<vmem>>, vector<10x1x128xf32>,
    %c0_78 = arith.constant 0 : index
    %c9_79 = arith.constant 9 : index
    %c0_80 = arith.constant 0 : index
    %86 = vector.load %arg12[%c0_78, %c9_79, %c0_80] : memref<10x10x128xf32, #tpu.memory_space<vmem>>, vector<10x1x128xf32>
    tpu.vector_store %arg12[%c0_78, %c9_79, %c0_80], %82 {strides = array<i32>} : memref<10x10x128xf32, #tpu.memory_space<vmem>>, vector<10x1x128xf32>,
    %87 = vector.shape_cast %80 : vector<64x128xf32> to vector<8x8x128xf32>
    %c1_81 = arith.constant 1 : index
    %c1_82 = arith.constant 1 : index
    %c0_83 = arith.constant 0 : index
    %88 = vector.load %arg12[%c1_81, %c1_82, %c0_83] : memref<10x10x128xf32, #tpu.memory_space<vmem>>, vector<8x8x128xf32>
    tpu.vector_store %arg12[%c1_81, %c1_82, %c0_83], %87 {strides = array<i32>} : memref<10x10x128xf32, #tpu.memory_space<vmem>>, vector<8x8x128xf32>,
    %cst_84 = arith.constant 0.000000e+00 : f32
    %89 = vector.broadcast %cst_84 : f32 to vector<64x128xf32>
    %c0_85 = arith.constant 0 : index
    %c0_86 = arith.constant 0 : index
    %c0_87 = arith.constant 0 : index
    %90 = vector.load %arg12[%c0_85, %c0_86, %c0_87] : memref<10x10x128xf32, #tpu.memory_space<vmem>>, vector<8x8x128xf32>
    %91 = vector.shape_cast %90 : vector<8x8x128xf32> to vector<64x128xf32>
    %92 = arith.truncf %91 : vector<64x128xf32> to vector<64x128xbf16>
    %c0_88 = arith.constant 0 : index
    %c0_89 = arith.constant 0 : index
    %c0_90 = arith.constant 0 : index
    %93 = vector.load %arg3[%c0_88, %c0_89, %c0_90] : memref<9x128x128xbf16, #tpu.memory_space<vmem>>, vector<1x128x128xbf16>
    %94 = vector.shape_cast %93 : vector<1x128x128xbf16> to vector<128x128xbf16>
    %cst_91 = arith.constant dense<0.000000e+00> : vector<64x128xf32>
    %95 = tpu.matmul %92, %94, %cst_91 {dimension_numbers = #tpu.dot_dimension_numbers<[1], [0], [0], [1], [0, 0, 1, 1], [], []>} : vector<64x128xbf16>, vector<128x128xbf16>, vector<64x128xf32> -> vector<64x128xf32>
    %96 = arith.addf %89, %95 : vector<64x128xf32>
    %c0_92 = arith.constant 0 : index
    %c1_93 = arith.constant 1 : index
    %c0_94 = arith.constant 0 : index
    %97 = vector.load %arg12[%c0_92, %c1_93, %c0_94] : memref<10x10x128xf32, #tpu.memory_space<vmem>>, vector<8x8x128xf32>
    %98 = vector.shape_cast %97 : vector<8x8x128xf32> to vector<64x128xf32>
    %99 = arith.truncf %98 : vector<64x128xf32> to vector<64x128xbf16>
    %c1_95 = arith.constant 1 : index
    %c0_96 = arith.constant 0 : index
    %c0_97 = arith.constant 0 : index
    %100 = vector.load %arg3[%c1_95, %c0_96, %c0_97] : memref<9x128x128xbf16, #tpu.memory_space<vmem>>, vector<1x128x128xbf16>
    %101 = vector.shape_cast %100 : vector<1x128x128xbf16> to vector<128x128xbf16>
    %cst_98 = arith.constant dense<0.000000e+00> : vector<64x128xf32>
    %102 = tpu.matmul %99, %101, %cst_98 {dimension_numbers = #tpu.dot_dimension_numbers<[1], [0], [0], [1], [0, 0, 1, 1], [], []>} : vector<64x128xbf16>, vector<128x128xbf16>, vector<64x128xf32> -> vector<64x128xf32>
    %103 = arith.addf %96, %102 : vector<64x128xf32>
    %c0_99 = arith.constant 0 : index
    %c2_100 = arith.constant 2 : index
    %c0_101 = arith.constant 0 : index
    %104 = vector.load %arg12[%c0_99, %c2_100, %c0_101] : memref<10x10x128xf32, #tpu.memory_space<vmem>>, vector<8x8x128xf32>
    %105 = vector.shape_cast %104 : vector<8x8x128xf32> to vector<64x128xf32>
    %106 = arith.truncf %105 : vector<64x128xf32> to vector<64x128xbf16>
    %c2_102 = arith.constant 2 : index
    %c0_103 = arith.constant 0 : index
    %c0_104 = arith.constant 0 : index
    %107 = vector.load %arg3[%c2_102, %c0_103, %c0_104] : memref<9x128x128xbf16, #tpu.memory_space<vmem>>, vector<1x128x128xbf16>
    %108 = vector.shape_cast %107 : vector<1x128x128xbf16> to vector<128x128xbf16>
    %cst_105 = arith.constant dense<0.000000e+00> : vector<64x128xf32>
    %109 = tpu.matmul %106, %108, %cst_105 {dimension_numbers = #tpu.dot_dimension_numbers<[1], [0], [0], [1], [0, 0, 1, 1], [], []>} : vector<64x128xbf16>, vector<128x128xbf16>, vector<64x128xf32> -> vector<64x128xf32>
    %110 = arith.addf %103, %109 : vector<64x128xf32>
    %c1_106 = arith.constant 1 : index
    %c0_107 = arith.constant 0 : index
    %c0_108 = arith.constant 0 : index
    %111 = vector.load %arg12[%c1_106, %c0_107, %c0_108] : memref<10x10x128xf32, #tpu.memory_space<vmem>>, vector<8x8x128xf32>
    %112 = vector.shape_cast %111 : vector<8x8x128xf32> to vector<64x128xf32>
    %113 = arith.truncf %112 : vector<64x128xf32> to vector<64x128xbf16>
    %c3_109 = arith.constant 3 : index
    %c0_110 = arith.constant 0 : index
    %c0_111 = arith.constant 0 : index
    %114 = vector.load %arg3[%c3_109, %c0_110, %c0_111] : memref<9x128x128xbf16, #tpu.memory_space<vmem>>, vector<1x128x128xbf16>
    %115 = vector.shape_cast %114 : vector<1x128x128xbf16> to vector<128x128xbf16>
    %cst_112 = arith.constant dense<0.000000e+00> : vector<64x128xf32>
    %116 = tpu.matmul %113, %115, %cst_112 {dimension_numbers = #tpu.dot_dimension_numbers<[1], [0], [0], [1], [0, 0, 1, 1], [], []>} : vector<64x128xbf16>, vector<128x128xbf16>, vector<64x128xf32> -> vector<64x128xf32>
    %117 = arith.addf %110, %116 : vector<64x128xf32>
    %c1_113 = arith.constant 1 : index
    %c1_114 = arith.constant 1 : index
    %c0_115 = arith.constant 0 : index
    %118 = vector.load %arg12[%c1_113, %c1_114, %c0_115] : memref<10x10x128xf32, #tpu.memory_space<vmem>>, vector<8x8x128xf32>
    %119 = vector.shape_cast %118 : vector<8x8x128xf32> to vector<64x128xf32>
    %120 = arith.truncf %119 : vector<64x128xf32> to vector<64x128xbf16>
    %c4_116 = arith.constant 4 : index
    %c0_117 = arith.constant 0 : index
    %c0_118 = arith.constant 0 : index
    %121 = vector.load %arg3[%c4_116, %c0_117, %c0_118] : memref<9x128x128xbf16, #tpu.memory_space<vmem>>, vector<1x128x128xbf16>
    %122 = vector.shape_cast %121 : vector<1x128x128xbf16> to vector<128x128xbf16>
    %cst_119 = arith.constant dense<0.000000e+00> : vector<64x128xf32>
    %123 = tpu.matmul %120, %122, %cst_119 {dimension_numbers = #tpu.dot_dimension_numbers<[1], [0], [0], [1], [0, 0, 1, 1], [], []>} : vector<64x128xbf16>, vector<128x128xbf16>, vector<64x128xf32> -> vector<64x128xf32>
    %124 = arith.addf %117, %123 : vector<64x128xf32>
    %c1_120 = arith.constant 1 : index
    %c2_121 = arith.constant 2 : index
    %c0_122 = arith.constant 0 : index
    %125 = vector.load %arg12[%c1_120, %c2_121, %c0_122] : memref<10x10x128xf32, #tpu.memory_space<vmem>>, vector<8x8x128xf32>
    %126 = vector.shape_cast %125 : vector<8x8x128xf32> to vector<64x128xf32>
    %127 = arith.truncf %126 : vector<64x128xf32> to vector<64x128xbf16>
    %c5_123 = arith.constant 5 : index
    %c0_124 = arith.constant 0 : index
    %c0_125 = arith.constant 0 : index
    %128 = vector.load %arg3[%c5_123, %c0_124, %c0_125] : memref<9x128x128xbf16, #tpu.memory_space<vmem>>, vector<1x128x128xbf16>
    %129 = vector.shape_cast %128 : vector<1x128x128xbf16> to vector<128x128xbf16>
    %cst_126 = arith.constant dense<0.000000e+00> : vector<64x128xf32>
    %130 = tpu.matmul %127, %129, %cst_126 {dimension_numbers = #tpu.dot_dimension_numbers<[1], [0], [0], [1], [0, 0, 1, 1], [], []>} : vector<64x128xbf16>, vector<128x128xbf16>, vector<64x128xf32> -> vector<64x128xf32>
    %131 = arith.addf %124, %130 : vector<64x128xf32>
    %c2_127 = arith.constant 2 : index
    %c0_128 = arith.constant 0 : index
    %c0_129 = arith.constant 0 : index
    %132 = vector.load %arg12[%c2_127, %c0_128, %c0_129] : memref<10x10x128xf32, #tpu.memory_space<vmem>>, vector<8x8x128xf32>
    %133 = vector.shape_cast %132 : vector<8x8x128xf32> to vector<64x128xf32>
    %134 = arith.truncf %133 : vector<64x128xf32> to vector<64x128xbf16>
    %c6_130 = arith.constant 6 : index
    %c0_131 = arith.constant 0 : index
    %c0_132 = arith.constant 0 : index
    %135 = vector.load %arg3[%c6_130, %c0_131, %c0_132] : memref<9x128x128xbf16, #tpu.memory_space<vmem>>, vector<1x128x128xbf16>
    %136 = vector.shape_cast %135 : vector<1x128x128xbf16> to vector<128x128xbf16>
    %cst_133 = arith.constant dense<0.000000e+00> : vector<64x128xf32>
    %137 = tpu.matmul %134, %136, %cst_133 {dimension_numbers = #tpu.dot_dimension_numbers<[1], [0], [0], [1], [0, 0, 1, 1], [], []>} : vector<64x128xbf16>, vector<128x128xbf16>, vector<64x128xf32> -> vector<64x128xf32>
    %138 = arith.addf %131, %137 : vector<64x128xf32>
    %c2_134 = arith.constant 2 : index
    %c1_135 = arith.constant 1 : index
    %c0_136 = arith.constant 0 : index
    %139 = vector.load %arg12[%c2_134, %c1_135, %c0_136] : memref<10x10x128xf32, #tpu.memory_space<vmem>>, vector<8x8x128xf32>
    %140 = vector.shape_cast %139 : vector<8x8x128xf32> to vector<64x128xf32>
    %141 = arith.truncf %140 : vector<64x128xf32> to vector<64x128xbf16>
    %c7_137 = arith.constant 7 : index
    %c0_138 = arith.constant 0 : index
    %c0_139 = arith.constant 0 : index
    %142 = vector.load %arg3[%c7_137, %c0_138, %c0_139] : memref<9x128x128xbf16, #tpu.memory_space<vmem>>, vector<1x128x128xbf16>
    %143 = vector.shape_cast %142 : vector<1x128x128xbf16> to vector<128x128xbf16>
    %cst_140 = arith.constant dense<0.000000e+00> : vector<64x128xf32>
    %144 = tpu.matmul %141, %143, %cst_140 {dimension_numbers = #tpu.dot_dimension_numbers<[1], [0], [0], [1], [0, 0, 1, 1], [], []>} : vector<64x128xbf16>, vector<128x128xbf16>, vector<64x128xf32> -> vector<64x128xf32>
    %145 = arith.addf %138, %144 : vector<64x128xf32>
    %c2_141 = arith.constant 2 : index
    %c2_142 = arith.constant 2 : index
    %c0_143 = arith.constant 0 : index
    %146 = vector.load %arg12[%c2_141, %c2_142, %c0_143] : memref<10x10x128xf32, #tpu.memory_space<vmem>>, vector<8x8x128xf32>
    %147 = vector.shape_cast %146 : vector<8x8x128xf32> to vector<64x128xf32>
    %148 = arith.truncf %147 : vector<64x128xf32> to vector<64x128xbf16>
    %c8_144 = arith.constant 8 : index
    %c0_145 = arith.constant 0 : index
    %c0_146 = arith.constant 0 : index
    %149 = vector.load %arg3[%c8_144, %c0_145, %c0_146] : memref<9x128x128xbf16, #tpu.memory_space<vmem>>, vector<1x128x128xbf16>
    %150 = vector.shape_cast %149 : vector<1x128x128xbf16> to vector<128x128xbf16>
    %cst_147 = arith.constant dense<0.000000e+00> : vector<64x128xf32>
    %151 = tpu.matmul %148, %150, %cst_147 {dimension_numbers = #tpu.dot_dimension_numbers<[1], [0], [0], [1], [0, 0, 1, 1], [], []>} : vector<64x128xbf16>, vector<128x128xbf16>, vector<64x128xf32> -> vector<64x128xf32>
    %152 = arith.addf %145, %151 : vector<64x128xf32>
    %c0_148 = arith.constant 0 : index
    %c0_149 = arith.constant 0 : index
    %153 = vector.load %arg7[%c0_148, %c0_149] : memref<1x128xf32, #tpu.memory_space<vmem>>, vector<1x128xf32>
    %154 = vector.broadcast %153 : vector<1x128xf32> to vector<64x128xf32>
    %155 = arith.mulf %152, %154 : vector<64x128xf32>
    %c0_150 = arith.constant 0 : index
    %c0_151 = arith.constant 0 : index
    %156 = vector.load %arg8[%c0_150, %c0_151] : memref<1x128xf32, #tpu.memory_space<vmem>>, vector<1x128xf32>
    %157 = vector.broadcast %156 : vector<1x128xf32> to vector<64x128xf32>
    %158 = arith.addf %155, %157 : vector<64x128xf32>
    %c3_152 = arith.constant 3 : index
    %c0_153 = arith.constant 0 : index
    %c0_154 = arith.constant 0 : index
    %c0_155 = arith.constant 0 : index
    %159 = vector.load %arg1[%c3_152, %c0_153, %c0_154, %c0_155] : memref<4x9x9x128xf32, #tpu.memory_space<vmem>>, vector<1x8x8x128xf32>
    %160 = vector.shape_cast %159 : vector<1x8x8x128xf32> to vector<8x8x128xf32>
    %161 = vector.shape_cast %160 : vector<8x8x128xf32> to vector<64x128xf32>
    %162 = arith.truncf %161 : vector<64x128xf32> to vector<64x128xbf16>
    %c0_156 = arith.constant 0 : index
    %c0_157 = arith.constant 0 : index
    %163 = vector.load %arg4[%c0_156, %c0_157] : memref<128x128xbf16, #tpu.memory_space<vmem>>, vector<128x128xbf16>
    %cst_158 = arith.constant dense<0.000000e+00> : vector<64x128xf32>
    %164 = tpu.matmul %162, %163, %cst_158 {dimension_numbers = #tpu.dot_dimension_numbers<[1], [0], [0], [1], [0, 0, 1, 1], [], []>} : vector<64x128xbf16>, vector<128x128xbf16>, vector<64x128xf32> -> vector<64x128xf32>
    %c0_159 = arith.constant 0 : index
    %c0_160 = arith.constant 0 : index
    %165 = vector.load %arg9[%c0_159, %c0_160] : memref<1x128xf32, #tpu.memory_space<vmem>>, vector<1x128xf32>
    %166 = vector.broadcast %165 : vector<1x128xf32> to vector<64x128xf32>
    %167 = arith.mulf %164, %166 : vector<64x128xf32>
    %c0_161 = arith.constant 0 : index
    %c0_162 = arith.constant 0 : index
    %168 = vector.load %arg10[%c0_161, %c0_162] : memref<1x128xf32, #tpu.memory_space<vmem>>, vector<1x128xf32>
    %169 = vector.broadcast %168 : vector<1x128xf32> to vector<64x128xf32>
    %170 = arith.addf %167, %169 : vector<64x128xf32>
    %171 = arith.addf %158, %170 : vector<64x128xf32>
    %cst_163 = arith.constant 0.000000e+00 : f32
    %172 = vector.broadcast %cst_163 : f32 to vector<64x128xf32>
    %173 = arith.maximumf %171, %172 : vector<64x128xf32>
    %c0_164 = arith.constant 0 : index
    %c0_165 = arith.constant 0 : index
    %c0_166 = arith.constant 0 : index
    %174 = vector.load %arg11[%c0_164, %c0_165, %c0_166] : memref<1x64x128xf32, #tpu.memory_space<vmem>>, vector<1x64x128xf32>
    %175 = vector.shape_cast %174 : vector<1x64x128xf32> to vector<64x128xf32>
    %176 = vector.shape_cast %173 : vector<64x128xf32> to vector<1x64x128xf32>
    tpu.vector_store %arg11[%c0_164, %c0_165, %c0_166], %176 {strides = array<i32>} : memref<1x64x128xf32, #tpu.memory_space<vmem>>, vector<1x64x128xf32>,
    return
  }
  func.func @transform_0(%arg0: i32) -> (i32, i32, i32, i32) {
    %c0_i32 = arith.constant 0 : i32
    %c0_i32_0 = arith.constant 0 : i32
    %c0_i32_1 = arith.constant 0 : i32
    %c0_i32_2 = arith.constant 0 : i32
    return %arg0, %c0_i32, %c0_i32_0, %c0_i32_1 : i32, i32, i32, i32
  }
  func.func @transform_1(%arg0: i32) -> (i32, i32, i32) {
    %c0_i32 = arith.constant 0 : i32
    %c0_i32_0 = arith.constant 0 : i32
    %c0_i32_1 = arith.constant 0 : i32
    %c0_i32_2 = arith.constant 0 : i32
    return %c0_i32, %c0_i32_0, %c0_i32_1 : i32, i32, i32
  }
  func.func @transform_2(%arg0: i32) -> (i32, i32, i32) {
    %c0_i32 = arith.constant 0 : i32
    %c0_i32_0 = arith.constant 0 : i32
    %c0_i32_1 = arith.constant 0 : i32
    %c0_i32_2 = arith.constant 0 : i32
    return %c0_i32, %c0_i32_0, %c0_i32_1 : i32, i32, i32
  }
  func.func @transform_3(%arg0: i32) -> (i32, i32) {
    %c0_i32 = arith.constant 0 : i32
    %c0_i32_0 = arith.constant 0 : i32
    %c0_i32_1 = arith.constant 0 : i32
    return %c0_i32, %c0_i32_0 : i32, i32
  }
  func.func @transform_4(%arg0: i32) -> (i32, i32) {
    %c0_i32 = arith.constant 0 : i32
    %c0_i32_0 = arith.constant 0 : i32
    %c0_i32_1 = arith.constant 0 : i32
    return %c0_i32, %c0_i32_0 : i32, i32
  }
  func.func @transform_5(%arg0: i32) -> (i32, i32) {
    %c0_i32 = arith.constant 0 : i32
    %c0_i32_0 = arith.constant 0 : i32
    %c0_i32_1 = arith.constant 0 : i32
    return %c0_i32, %c0_i32_0 : i32, i32
  }
  func.func @transform_6(%arg0: i32) -> (i32, i32) {
    %c0_i32 = arith.constant 0 : i32
    %c0_i32_0 = arith.constant 0 : i32
    %c0_i32_1 = arith.constant 0 : i32
    return %c0_i32, %c0_i32_0 : i32, i32
  }
  func.func @transform_7(%arg0: i32) -> (i32, i32) {
    %c0_i32 = arith.constant 0 : i32
    %c0_i32_0 = arith.constant 0 : i32
    %c0_i32_1 = arith.constant 0 : i32
    return %c0_i32, %c0_i32_0 : i32, i32
  }
  func.func @transform_8(%arg0: i32) -> (i32, i32) {
    %c0_i32 = arith.constant 0 : i32
    %c0_i32_0 = arith.constant 0 : i32
    %c0_i32_1 = arith.constant 0 : i32
    return %c0_i32, %c0_i32_0 : i32, i32
  }
  func.func @transform_9(%arg0: i32) -> (i32, i32) {
    %c0_i32 = arith.constant 0 : i32
    %c0_i32_0 = arith.constant 0 : i32
    %c0_i32_1 = arith.constant 0 : i32
    return %c0_i32, %c0_i32_0 : i32, i32
  }
  func.func @transform_10(%arg0: i32) -> (i32, i32, i32) {
    %c0_i32 = arith.constant 0 : i32
    %c0_i32_0 = arith.constant 0 : i32
    %c0_i32_1 = arith.constant 0 : i32
    return %arg0, %c0_i32, %c0_i32_0 : i32, i32, i32
  }
}

</mosaic_0001>

<bundles_post_ra>
// kernel: tpu_custom_call.1
= control target key start
LH: loop header
LB: loop body
LE: loop exit
PB: predicated region body
PF: predicated region fallthrough
CT: control target
= control target key end

     0   :  { %15 = vsyncpa [#allocation4], 0  ;;  %s5973_s0 = inlined_call_operand.vmem [shape: f32[8,9,9,128], index: 0, kind: input, shape index: {}]   ;;  %s5974_s1 = inlined_call_operand.vmem [shape: bf16[9,128,128], index: 1, kind: input, shape index: {}]   ;;  %s5975_s2 = inlined_call_operand.vmem [shape: bf16[9,128,128], index: 2, kind: input, shape index: {}]   ;;  %s5976_s3 = inlined_call_operand.vmem [shape: bf16[128,128], index: 3, kind: input, shape index: {}]   ;;  %s5977_s4 = inlined_call_operand.vmem [shape: f32[1,128], index: 4, kind: input, shape index: {}]   ;;  %s5978_s5 = inlined_call_operand.vmem [shape: f32[1,128], index: 5, kind: input, shape index: {}]   ;;  %s5979_s6 = inlined_call_operand.vmem [shape: f32[1,128], index: 6, kind: input, shape index: {}]   ;;  %s5980_s7 = inlined_call_operand.vmem [shape: f32[1,128], index: 7, kind: input, shape index: {}]   ;;  %s5981_s8 = inlined_call_operand.vmem [shape: f32[1,128], index: 8, kind: input, shape index: {}]   ;;  %s5982_s9 = inlined_call_operand.vmem [shape: f32[1,128], index: 9, kind: input, shape index: {}]   ;;  %s5983_s10 = inlined_call_operand.hbm [shape: f32[2,64,128], index: 10, kind: output, shape index: {}]  }
   0x1   :  { %17 = vsyncpa [#allocation4 + $0x1], 0  ;;  %s5053_s13 = smov 0   ;;  %s5055_s14 = smov 0  }
   0x2   :  { %s5057_s15 = smov 0   ;;  %s5059_s16 = smov 0  }
   0x3 LB: > { %s5074_s17 = sadd.s32 4294967295, %s4992_s16   ;;  %s3409_s18 = sadd.s32 4294967294, %s4992_s16   ;;  %s4992_s16 = sphi %s5059_s16, %s5989_s16   ;;  %s4988_s15 = sphi %s5057_s15, %s5988_s15   ;;  %s4984_s14 = sphi %s5055_s14, %s5987_s14   ;;  %s4980_s13 = sphi %s5053_s13, %s5986_s13  }
   0x4   : > { %s5078_s19 = sadd.s32 1, %s4992_s16   ;;  %s245_s20 = sadd.s32 1, %s4988_s15 }
   0x5   : > { %s242_s21 = ssub.s32 %s4992_s16, %s5078_s19  ;;  %p255_p0 = scmp.ne.s32.totalorder %s4988_s15, %s4984_s14 }
   0x6   : > { %p243_p1 = scmp.eq.s32.totalorder %s242_s21, 0  ;;  %p256_p2 = scmp.eq.s32.totalorder %s5074_s17, 1 }
   0x7   : > { %p261_p3 = scmp.ne.s32.totalorder %s4984_s14, %s4980_s13  ;;  %p262_p4 = scmp.eq.s32.totalorder %s3409_s18, 1 }
   0x8   : > { %s5089_s22 = scalar_select %p243_p1, %s4988_s15, %s245_s20  }
   0x9   : > { %p5091_p5 = por %p256_p2, %p255_p0  ;;  %p5095_p6 = por %p262_p4, %p261_p3 }
   0xa   : > { %p3412_p7 = scmp.ge.s32.totalorder %s4992_s16, 1  ;;  %p317_p8 = scmp.lt.s32.totalorder %s4992_s16, 3 }
   0xc   : > { %p318_p9 = pnand %p3412_p7, %p317_p8 }
   0xd   : > { %v4771_v0 = vld [vmem:[%s5974_s1 + $0x40] sm:$0xff] (!%p318_p9)   ;;  %s3414_s27 = sshll.u32 (!%p318_p9), %s5074_s17, 2  ;;  %v4772_v1 = vld [vmem:[%s5974_s1 + $0x48] sm:$0xff] (!%p318_p9)   ;;  %v4773_v2 = vld [vmem:[%s5974_s1 + $0x50] sm:$0xff] (!%p318_p9)   ;;  %s353_s20 = sand.u32 (!%p318_p9), 1, %s4984_s14  }
   0xe   : > { %321 = sbr.rel (%p318_p9) target bundleno = 1051 (0x41b), region = 60  ;;  %p357_p10 = scmp.lt.s32.totalorder (!%p318_p9), %s3414_s27, 7  ;;  %4128 = vmatprep.subr.bf16.mxu0 (!%p318_p9), %v4771_v0  ;;  %v4774_v3 = vld [vmem:[%s5974_s1 + $0x58] sm:$0xff] (!%p318_p9)   ;;  %v4775_v7 = vld [vmem:[%s5974_s1 + $0x60] sm:$0xff] (!%p318_p9)   ;;  %v4776_v8 = vld [vmem:[%s5974_s1 + $0x68] sm:$0xff] (!%p318_p9)  }
   0xf   : > { %4129 = vmatpush3.bf16.msra.mxu0 (!%p318_p9), %v4771_v0  ;;  %v4777_v9 = vld [vmem:[%s5974_s1 + $0x70] sm:$0xff] (!%p318_p9)   ;;  %v4778_v10 = vld [vmem:[%s5974_s1 + $0x78] sm:$0xff] (!%p318_p9)   ;;  %v4779_v11 = vld [vmem:[%s5974_s1] sm:$0xff] (!%p318_p9)   ;;  %s3413_s21 = sshll.u32 (!%p318_p9), %s353_s20, 6 }
  0x10   : > { %4130 = vmatprep.subr.bf16.mxu0 (!%p318_p9), %v4772_v1  ;;  %v4780_v18 = vld [vmem:[%s5974_s1 + $0x8] sm:$0xff] (!%p318_p9)   ;;  %v4781_v19 = vld [vmem:[%s5974_s1 + $0x10] sm:$0xff] (!%p318_p9)   ;;  %v4782_v26 = vld [vmem:[%s5974_s1 + $0x18] sm:$0xff] (!%p318_p9)   ;;  %s5911_s25 = scalar_lea.vmem (!%p318_p9), [#allocation3], %s3413_s21 }
  0x11   : > { %v4783_v27 = vld [vmem:[%s5974_s1 + $0x20] sm:$0xff] (!%p318_p9)   ;;  %v4784_v28 = vld [vmem:[%s5974_s1 + $0x28] sm:$0xff] (!%p318_p9)   ;;  %v4785_v29 = vld [vmem:[%s5974_s1 + $0x30] sm:$0xff] (!%p318_p9)   ;;  %s3347_s28 = sshll.u32 (!%p318_p9), %s5911_s25, 4  ;;  %s5925_s28 = int_to_ptr.vmem [resolvable:$true] %s3347_s28 }
  0x12   : > { %v4786_v30 = vld [vmem:[%s5974_s1 + $0x38] sm:$0xff] (!%p318_p9)   ;;  %v4787_v31 = vld [vmem:[%s5974_s1 + $0x80] sm:$0xff] (!%p318_p9)   ;;  %v4788_v38 = vld [vmem:[%s5974_s1 + $0x88] sm:$0xff] (!%p318_p9)   ;;  %s4930_s11 = scalar_lea.vmem (!%p318_p9), %s5925_s28, 1024 }
  0x13   : > { %4131 = vmatpush3.bf16.msra.mxu0 (!%p318_p9), %v4772_v1  ;;  %v4789_v41 = vld [vmem:[%s5974_s1 + $0x90] sm:$0xff] (!%p318_p9)   ;;  %v4790_v45 = vld [vmem:[%s5974_s1 + $0x98] sm:$0xff] (!%p318_p9)   ;;  %v4791_v47 = vld [vmem:[%s5974_s1 + $0xa0] sm:$0xff] (!%p318_p9)   ;;  %p4931_p11 = scmp.ne.s32.totalorder (!%p318_p9), %s5925_s28, %s4930_s11 }
  0x14   : > { %4132 = vmatprep.subr.bf16.mxu0 (!%p318_p9), %v4773_v2  ;;  %v4792_v48 = vld [vmem:[%s5974_s1 + $0xa8] sm:$0xff] (!%p318_p9)   ;;  %v4793_v49 = vld [vmem:[%s5974_s1 + $0xb0] sm:$0xff] (!%p318_p9)   ;;  %v4794_v50 = vld [vmem:[%s5974_s1 + $0xb8] sm:$0xff] (!%p318_p9)  }
  0x15   : > { %s5991_s27 = smov (!%p357_p10, %s3414_s27), 7  ;;  %v4795_v53 = vld [vmem:[%s5974_s1 + $0xc0] sm:$0xff]   ;;  %v4796_v57 = vld [vmem:[%s5974_s1 + $0xc8] sm:$0xff]   ;;  %v4797_v61 = vld [vmem:[%s5974_s1 + $0xd0] sm:$0xff]   ;;  %p4932_p12 = pnand %p4931_p11, %p5091_p5 }
  0x16   : > { %s4728_s12 = smul.u32 144, %s5991_s27  ;;  %v4798_v1 = vld [vmem:[%s5974_s1 + $0xd8] sm:$0xff]   ;;  %s3899_s27 = sshll.u32 %s5074_s17, 10 }
  0x17   : > { %4133 = vmatpush3.bf16.msra.mxu0 %v4773_v2  ;;  %s5932_s17 = scalar_lea.sflag [#allocation4], %s353_s20  ;;  %p4933_p13 = pneg %p4932_p12 }
  0x18   : > { %s5117_s26 = scalar_lea.vmem %s5973_s0, %s4728_s12  ;;  %4134 = vmatprep.subr.bf16.mxu0 %v4774_v3  ;;  %s4995_s12 = smov [#allocation3]  }
  0x19   : > { %v3416_v4 = vld [vmem:[%s5117_s26 + $0x90] sm:$0xff]  ;;  %v3417_v5 = vld [vmem:[%s5117_s26 + $0xa0] sm:$0xff]  ;;  %s4934_s18 = sshll.u32 %s4995_s12, 4  ;;  %s4935_s18 = int_to_ptr.vmem [resolvable:$false] %s4934_s18 }
  0x1a   : > { %v401_v6 = vpack.c.bf16 %v3417_v5, %v3416_v4  ;;  %v3418_v12 = vld [vmem:[%s5117_s26 + $0xb0] sm:$0xff]  ;;  %v3419_v13 = vld [vmem:[%s5117_s26 + $0xc0] sm:$0xff]  ;;  %v4800_v4 = vld [vmem:[%s5974_s1 + $0xe8] sm:$0xff]   ;;  %s4936_s21 = scalar_lea.vmem %s4935_s18, 2048  ;;  %p4937_p0 = scmp.lt.s32.totalorder %s5925_s28, %s4935_s18 }
  0x1b   : > { %4135 = vmatpush3.bf16.msra.mxu0 %v4774_v3  ;;  %v3420_v14 = vld [vmem:[%s5117_s26 + $0xd0] sm:$0xff]  ;;  %v3421_v15 = vld [vmem:[%s5117_s26 + $0xe0] sm:$0xff]  ;;  %v402_v16 = vpack.c.bf16 %v3419_v13, %v3418_v12  ;;  %v4804_v13 = vld [vmem:[%s5974_s1 + $0x108] sm:$0xff]   ;;  %p4938_p1 = scmp.lt.s32.totalorder %s4936_s21, %s4930_s11 }
  0x1c   : > { %4144 = vmatprep.mubr.bf16.mxu0 %v401_v6  ;;  %4136 = vmatprep.subr.bf16.mxu0 %v4775_v7  ;;  %v403_v17 = vpack.c.bf16 %v3421_v15, %v3420_v14  ;;  %v3422_v20 = vld [vmem:[%s5117_s26 + $0xf0] sm:$0xff]  ;;  %v3423_v21 = vld [vmem:[%s5117_s26 + $0x100] sm:$0xff]  ;;  %v4802_v6 = vld [vmem:[%s5974_s1 + $0xf8] sm:$0xff]  }
  0x1d   : > { %v364_v22 = vld [vmem:[%s5117_s26] sm:$0xff]  ;;  %v5150_v23 = vld [vmem:[%s5117_s26 + $0x10] sm:$0xff]  ;;  %v404_v24 = vpack.c.bf16 %v3423_v21, %v3422_v20  ;;  %v4806_v21 = vld [vmem:[%s5974_s1 + $0x118] sm:$0xff]   ;;  %p4939_p2 = por %p4938_p1, %p4937_p0 }
  0x1e   : > { %v372_v25 = vpack.c.bf16 %v5150_v23, %v364_v22  ;;  %v5172_v32 = vld [vmem:[%s5117_s26 + $0x20] sm:$0xff]  ;;  %v5175_v33 = vld [vmem:[%s5117_s26 + $0x30] sm:$0xff] }
  0x1f   : > { %4137 = vmatpush3.bf16.msra.mxu0 %v4775_v7  ;;  %v5178_v34 = vld [vmem:[%s5117_s26 + $0x40] sm:$0xff]  ;;  %v5181_v35 = vld [vmem:[%s5117_s26 + $0x50] sm:$0xff]  ;;  %v373_v36 = vpack.c.bf16 %v5175_v33, %v5172_v32  ;;  %p4940_p3 = pnand %p4939_p2, %p4933_p13 }
  0x20   : > { %4138 = vmatprep.subr.bf16.mxu0 %v4776_v8  ;;  %v374_v37 = vpack.c.bf16 %v5181_v35, %v5178_v34  ;;  %v5191_v39 = vld [vmem:[%s5117_s26 + $0x60] sm:$0xff]  ;;  %v5194_v40 = vld [vmem:[%s5117_s26 + $0x70] sm:$0xff] }
  0x21   : > { %v648_v42 = vld [vmem:[%s5117_s26 + $0x1] sm:$0xff]  ;;  %v5201_v43 = vld [vmem:[%s5117_s26 + $0x11] sm:$0xff]  ;;  %v375_v44 = vpack.c.bf16 %v5194_v40, %v5191_v39 }
  0x22   : > { %v656_v46 = vpack.c.bf16 %v5201_v43, %v648_v42  ;;  %v5222_v51 = vld [vmem:[%s5117_s26 + $0x21] sm:$0xff]  ;;  %v5225_v52 = vld [vmem:[%s5117_s26 + $0x31] sm:$0xff] }
  0x23   : > { %4139 = vmatpush3.bf16.msra.mxu0 %v4776_v8  ;;  %v5231_v54 = vld [vmem:[%s5117_s26 + $0x41] sm:$0xff]  ;;  %v5234_v55 = vld [vmem:[%s5117_s26 + $0x51] sm:$0xff]  ;;  %v657_v56 = vpack.c.bf16 %v5225_v52, %v5222_v51 }
  0x24   : > { %4140 = vmatprep.subr.bf16.mxu0 %v4777_v9  ;;  %v658_v58 = vpack.c.bf16 %v5234_v55, %v5231_v54  ;;  %v5244_v59 = vld [vmem:[%s5117_s26 + $0x61] sm:$0xff]  ;;  %v5247_v60 = vld [vmem:[%s5117_s26 + $0x71] sm:$0xff] }
  0x25   : > { %v3480_v62 = vld [vmem:[%s5117_s26 + $0x120] sm:$0xff]  ;;  %v3481_v63 = vld [vmem:[%s5117_s26 + $0x130] sm:$0xff]  ;;  %v659_v0 = vpack.c.bf16 %v5247_v60, %v5244_v59 }
  0x26   : > { %v807_v2 = vpack.c.bf16 %v3481_v63, %v3480_v62  ;;  %v4799_v3 = vld [vmem:[%s5974_s1 + $0xe0] sm:$0xff]   ;;  %v4801_v5 = vld [vmem:[%s5974_s1 + $0xf0] sm:$0xff]   ;;  %v4846_v62 = vld [vmem:[%s5975_s2 + $0x58] sm:$0xff]  }
  0x27   : > { %4141 = vmatpush3.bf16.msra.mxu0 %v4777_v9  ;;  %v3482_v7 = vld [vmem:[%s5117_s26 + $0x140] sm:$0xff]  ;;  %v3483_v8 = vld [vmem:[%s5117_s26 + $0x150] sm:$0xff] }
  0x28   : > { %4142 = vmatprep.subr.bf16.mxu0 %v4778_v10  ;;  %v4803_v9 = vld [vmem:[%s5974_s1 + $0x100] sm:$0xff]   ;;  %v808_v12 = vpack.c.bf16 %v3483_v8, %v3482_v7  ;;  %v3518_v42 = vld [vmem:[%s5117_s26 + $0x210] sm:$0xff]  ;;  %v4820_v8 = vld [vmem:[%s5974_s1 + $0x188] sm:$0xff]  }
  0x29   : > { %v3486_v15 = vld [vmem:[%s5117_s26 + $0x180] sm:$0xff]  ;;  %v4817_v63 = vld [vmem:[%s5974_s1 + $0x170] sm:$0xff]  }
  0x2b   : > { %4143 = vmatpush3.bf16.msra.mxu0 %v4778_v10  ;;  %v3484_v10 = vld [vmem:[%s5117_s26 + $0x160] sm:$0xff] }
  0x2c   : > { %4152 = vmatprep.subr.bf16.mxu0 %v4779_v11 }
  0x2e   : > { %4145 = vmatmul.mubr.bf16.vlgmr.msra.gmra.mrb[0].mxu0 %v402_v16  ;;  %v3487_v16 = vld [vmem:[%s5117_s26 + $0x190] sm:$0xff] }
  0x2f   : > { %4153 = vmatpush3.bf16.msra.mxu0 %v4779_v11  ;;  %4148 = vmatprep.mubr.bf16.mxu0 %v403_v17  ;;  %v3485_v11 = vld [vmem:[%s5117_s26 + $0x170] sm:$0xff]  ;;  %v810_v20 = vpack.c.bf16 %v3487_v16, %v3486_v15  ;;  %v4823_v15 = vld [vmem:[%s5974_s1 + $0x1a0] sm:$0xff]   ;;  %v4824_v16 = vld [vmem:[%s5974_s1 + $0x1a8] sm:$0xff]  }
  0x30   : > { %4154 = vmatprep.subr.bf16.mxu0 %v4780_v18  ;;  %v809_v14 = vpack.c.bf16 %v3485_v11, %v3484_v10  ;;  %v4805_v17 = vld [vmem:[%s5974_s1 + $0x110] sm:$0xff]  }
  0x31   : > { %v3551_v10 = vld [vmem:[%s5117_s26 + $0x191] sm:$0xff] }
  0x32   : > { %v4821_v11 = vld [vmem:[%s5974_s1 + $0x190] sm:$0xff]  }
  0x33   : > { %4155 = vmatpush3.bf16.msra.mxu0 %v4780_v18  ;;  %v3512_v18 = vld [vmem:[%s5117_s26 + $0x1b0] sm:$0xff] }
  0x34   : > { %4156 = vmatprep.subr.bf16.mxu0 %v4781_v19 }
  0x36   : > { %4149 = vmatmul.mubr.bf16.gmra.mrb[4].mxu0 %v404_v24  ;;  %v4807_v24 = vld [vmem:[%s5974_s1 + $0x120] sm:$0xff]  }
  0x37   : > { %4157 = vmatpush3.bf16.msra.mxu0 %v4781_v19  ;;  %4168 = vmatprep.mubr.bf16.mxu0 %v372_v25  ;;  %v3513_v19 = vld [vmem:[%s5117_s26 + $0x1c0] sm:$0xff]  ;;  %v4808_v25 = vld [vmem:[%s5974_s1 + $0x128] sm:$0xff]  }
  0x38   : > { %4158 = vmatprep.subr.bf16.mxu0 %v4782_v26  ;;  %v958_v22 = vpack.c.bf16 %v3513_v19, %v3512_v18  ;;  %v1260_v18 = vpack.c.bf16 %v5178_v34, %v5175_v33  ;;  %v1261_v19 = vpack.c.bf16 %v5191_v39, %v5181_v35  ;;  %v4923_v34 = vld [vmem:[%s5117_s26 + $0xa0] sm:$0xff]  ;;  %v4830_v39 = vld [vmem:[%s5974_s1 + $0x1d8] sm:$0xff]  }
  0x3b   : > { %4159 = vmatpush3.bf16.msra.mxu0 %v4782_v26  ;;  %v4809_v26 = vld [vmem:[%s5974_s1 + $0x130] sm:$0xff]  }
  0x3c   : > { %4160 = vmatprep.subr.bf16.mxu0 %v4783_v27 }
  0x3f   : > { %4161 = vmatpush3.bf16.msra.mxu0 %v4783_v27  ;;  %v4810_v27 = vld [vmem:[%s5974_s1 + $0x138] sm:$0xff]  }
  0x40   : > { %4162 = vmatprep.subr.bf16.mxu0 %v4784_v28 }
  0x43   : > { %4163 = vmatpush3.bf16.msra.mxu0 %v4784_v28  ;;  %v3514_v28 = vld [vmem:[%s5117_s26 + $0x1d0] sm:$0xff] }
  0x44   : > { %4164 = vmatprep.subr.bf16.mxu0 %v4785_v29 }
  0x47   : > { %4165 = vmatpush3.bf16.msra.mxu0 %v4785_v29  ;;  %v3515_v29 = vld [vmem:[%s5117_s26 + $0x1e0] sm:$0xff] }
  0x48   : > { %4166 = vmatprep.subr.bf16.mxu0 %v4786_v30 }
  0x4b   : > { %4167 = vmatpush3.bf16.msra.mxu0 %v4786_v30  ;;  %v4811_v30 = vld [vmem:[%s5974_s1 + $0x140] sm:$0xff]  }
  0x4c   : > { %4176 = vmatprep.subr.bf16.mxu0 %v4787_v31 }
  0x4e   : > { %4169 = vmatmul.mubr.bf16.vlgmr.msra.gmra.mrb[0].mxu0 %v373_v36  ;;  %v3517_v36 = vld [vmem:[%s5117_s26 + $0x200] sm:$0xff] }
  0x4f   : > { %4177 = vmatpush3.bf16.msra.mxu0 %v4787_v31  ;;  %4172 = vmatprep.mubr.bf16.mxu0 %v374_v37  ;;  %v3516_v31 = vld [vmem:[%s5117_s26 + $0x1f0] sm:$0xff]  ;;  %v959_v37 = vpack.c.bf16 %v3515_v29, %v3514_v28  ;;  %v4835_v28 = vld [vmem:[%s5974_s1 + $0x200] sm:$0xff]  }
  0x50   : > { %4178 = vmatprep.subr.bf16.mxu0 %v4788_v38  ;;  %v4925_v29 = vld [vmem:[%s5117_s26 + $0xc0] sm:$0xff] }
  0x53   : > { %4179 = vmatpush3.bf16.msra.mxu0 %v4788_v38  ;;  %v960_v38 = vpack.c.bf16 %v3517_v36, %v3516_v31  ;;  %v4927_v36 = vld [vmem:[%s5117_s26 + $0xe0] sm:$0xff] }
  0x54   : > { %4180 = vmatprep.subr.bf16.mxu0 %v4789_v41 }
  0x56   : > { %4173 = vmatmul.mubr.bf16.gmra.mrb[4].mxu0 %v375_v44  ;;  %v3519_v44 = vld [vmem:[%s5117_s26 + $0x220] sm:$0xff] }
  0x57   : > { %4181 = vmatpush3.bf16.msra.mxu0 %v4789_v41  ;;  %4192 = vmatprep.mubr.bf16.mxu0 %v656_v46  ;;  %v4812_v41 = vld [vmem:[%s5974_s1 + $0x148] sm:$0xff]  }
  0x58   : > { %4182 = vmatprep.subr.bf16.mxu0 %v4790_v45  ;;  %v3544_v46 = vld [vmem:[%s5117_s26 + $0x121] sm:$0xff] }
  0x5b   : > { %4183 = vmatpush3.bf16.msra.mxu0 %v4790_v45  ;;  %v4813_v45 = vld [vmem:[%s5974_s1 + $0x150] sm:$0xff]  }
  0x5c   : > { %4184 = vmatprep.subr.bf16.mxu0 %v4791_v47 }
  0x5f   : > { %4185 = vmatpush3.bf16.msra.mxu0 %v4791_v47  ;;  %v3545_v47 = vld [vmem:[%s5117_s26 + $0x131] sm:$0xff] }
  0x60   : > { %4186 = vmatprep.subr.bf16.mxu0 %v4792_v48 }
  0x63   : > { %4187 = vmatpush3.bf16.msra.mxu0 %v4792_v48  ;;  %v961_v48 = vpack.c.bf16 %v3519_v44, %v3518_v42  ;;  %v3615_v42 = vld [vmem:[%s5117_s26 + $0x110] sm:$0xff] }
  0x64   : > { %4188 = vmatprep.subr.bf16.mxu0 %v4793_v49  ;;  %v4837_v44 = vld [vmem:[%s5974_s1 + $0x210] sm:$0xff]  }
  0x67   : > { %4189 = vmatpush3.bf16.msra.mxu0 %v4793_v49  ;;  %v1108_v49 = vpack.c.bf16 %v3545_v47, %v3544_v46  ;;  %v1560_v47 = vpack.c.bf16 %v5222_v51, %v5201_v43  ;;  %v4840_v43 = vld [vmem:[%s5974_s1 + $0x228] sm:$0xff]   ;;  %v4841_v51 = vld [vmem:[%s5974_s1 + $0x230] sm:$0xff]  }
  0x68   : > { %4190 = vmatprep.subr.bf16.mxu0 %v4794_v50 }
  0x6b   : > { %4191 = vmatpush3.bf16.msra.mxu0 %v4794_v50  ;;  %v4814_v50 = vld [vmem:[%s5974_s1 + $0x158] sm:$0xff]  }
  0x6c   : > { %4200 = vmatprep.subr.bf16.mxu0 %v4795_v53 }
  0x6e   : > { %4193 = vmatmul.mubr.bf16.vlgmr.msra.gmra.mrb[0].mxu0 %v657_v56  ;;  %v4844_v56 = vld [vmem:[%s5975_s2 + $0x48] sm:$0xff]  }
  0x6f   : > { %4201 = vmatpush3.bf16.msra.mxu0 %v4795_v53  ;;  %4196 = vmatprep.mubr.bf16.mxu0 %v658_v58  ;;  %v4843_v53 = vld [vmem:[%s5975_s2 + $0x40] sm:$0xff]   ;;  %v4845_v58 = vld [vmem:[%s5975_s2 + $0x50] sm:$0xff]  }
  0x70   : > { %4202 = vmatprep.subr.bf16.mxu0 %v4796_v57  ;;  %4344 = vmatprep.subr.bf16.mxu1 %v4843_v53 }
  0x71   : > { %4345 = vmatpush3.bf16.msra.mxu1 %v4843_v53  ;;  %v1561_v53 = vpack.c.bf16 %v5231_v54, %v5225_v52  ;;  %v4848_v52 = vld [vmem:[%s5975_s2 + $0x68] sm:$0xff]   ;;  %v4994_v54 = vmov 0.0  }
  0x72   : > { %4346 = vmatprep.subr.bf16.mxu1 %v4844_v56  ;;  %1740 = vst [vmem:[#allocation2] sm:$0xff] %v4994_v54  ;;  %1741 = vst [vmem:[#allocation2 + $0x8] sm:$0x3] %v4994_v54 }
  0x73   : > { %4203 = vmatpush3.bf16.msra.mxu0 %v4796_v57  ;;  %v4815_v57 = vld [vmem:[%s5974_s1 + $0x160] sm:$0xff]   ;;  %1743 = vst [vmem:[#allocation2 + $0x90] sm:$0xff] %v4994_v54  ;;  %1744 = vst [vmem:[#allocation2 + $0x98] sm:$0x3] %v4994_v54 }
  0x74   : > { %4204 = vmatprep.subr.bf16.mxu0 %v4797_v61  ;;  %1746 = vst [vmem:[#allocation2 + $0x10] sm:$0x1] %v4994_v54  ;;  %1747 = vst [vmem:[#allocation2 + $0x20] sm:$0x1] %v4994_v54 }
  0x75   : > { %4347 = vmatpush3.bf16.msra.mxu1 %v4844_v56  ;;  %v1562_v56 = vpack.c.bf16 %v5244_v59, %v5234_v55  ;;  %1748 = vst [vmem:[#allocation2 + $0x30] sm:$0x1] %v4994_v54  ;;  %1749 = vst [vmem:[#allocation2 + $0x40] sm:$0x1] %v4994_v54  ;;  %v4849_v55 = vld [vmem:[%s5975_s2 + $0x70] sm:$0xff]   ;;  %v4850_v59 = vld [vmem:[%s5975_s2 + $0x78] sm:$0xff]  }
  0x76   : > { %4197 = vmatmul.mubr.bf16.gmra.mrb[4].mxu0 %v659_v0  ;;  %4348 = vmatprep.subr.bf16.mxu1 %v4845_v58  ;;  %v4818_v0 = vld [vmem:[%s5974_s1 + $0x178] sm:$0xff]   ;;  %1750 = vst [vmem:[#allocation2 + $0x50] sm:$0x1] %v4994_v54  ;;  %1751 = vst [vmem:[#allocation2 + $0x60] sm:$0x1] %v4994_v54 }
  0x77   : > { %4205 = vmatpush3.bf16.msra.mxu0 %v4797_v61  ;;  %4216 = vmatprep.mubr.bf16.mxu0 %v807_v2  ;;  %v4816_v61 = vld [vmem:[%s5974_s1 + $0x168] sm:$0xff]   ;;  %v3547_v2 = vld [vmem:[%s5117_s26 + $0x151] sm:$0xff]  ;;  %1752 = vst [vmem:[#allocation2 + $0x70] sm:$0x1] %v4994_v54  ;;  %1753 = vst [vmem:[#allocation2 + $0x80] sm:$0x1] %v4994_v54 }
  0x78   : > { %4206 = vmatprep.subr.bf16.mxu0 %v4798_v1  ;;  %1756 = vst [vmem:[#allocation2 + $0x19] sm:$0x1] %v4994_v54  ;;  %1757 = vst [vmem:[#allocation2 + $0x29] sm:$0x1] %v4994_v54 }
  0x79   : > { %4349 = vmatpush3.bf16.msra.mxu1 %v4845_v58  ;;  %1758 = vst [vmem:[#allocation2 + $0x39] sm:$0x1] %v4994_v54  ;;  %1759 = vst [vmem:[#allocation2 + $0x49] sm:$0x1] %v4994_v54 }
  0x7a   : > { %4350 = vmatprep.subr.bf16.mxu1 %v4846_v62  ;;  %1760 = vst [vmem:[#allocation2 + $0x59] sm:$0x1] %v4994_v54  ;;  %1761 = vst [vmem:[#allocation2 + $0x69] sm:$0x1] %v4994_v54 }
  0x7b   : > { %4207 = vmatpush3.bf16.msra.mxu0 %v4798_v1  ;;  %v3546_v1 = vld [vmem:[%s5117_s26 + $0x141] sm:$0xff]  ;;  %1762 = vst [vmem:[#allocation2 + $0x79] sm:$0x1] %v4994_v54  ;;  %1763 = vst [vmem:[#allocation2 + $0x89] sm:$0x1] %v4994_v54 }
  0x7c   : > { %4208 = vmatprep.subr.bf16.mxu0 %v4799_v3  ;;  %1755 = vst [vmem:[#allocation2 + $0x9] sm:$0x1] %v4994_v54  ;;  %1745 = vst [vmem:[#allocation2] sm:$0x1] %v4994_v54 }
  0x7d   : > { %4351 = vmatpush3.bf16.msra.mxu1 %v4846_v62  ;;  %1754 = vst [vmem:[#allocation2 + $0x90] sm:$0x1] %v4994_v54  ;;  %1764 = vst [vmem:[#allocation2 + $0x99] sm:$0x1] %v4994_v54  ;;  %v3672_v62 = vld [vmem:[%s5977_s4] ss:$0 sm:$0xff] }
  0x7e   : > { %v4857_v54 = vld [vmem:[%s5975_s2 + $0x30] sm:$0xff]  }
  0x7f   : > { %4209 = vmatpush3.bf16.msra.mxu0 %v4799_v3  ;;  %v4819_v3 = vld [vmem:[%s5974_s1 + $0x180] sm:$0xff]  }
  0x80   : > { %4210 = vmatprep.subr.bf16.mxu0 %v4800_v4 }
  0x83   : > { %4211 = vmatpush3.bf16.msra.mxu0 %v4800_v4  ;;  %v3548_v4 = vld [vmem:[%s5117_s26 + $0x161] sm:$0xff] }
  0x84   : > { %4212 = vmatprep.subr.bf16.mxu0 %v4801_v5 }
  0x87   : > { %4213 = vmatpush3.bf16.msra.mxu0 %v4801_v5  ;;  %v3549_v5 = vld [vmem:[%s5117_s26 + $0x171] sm:$0xff] }
  0x88   : > { %4214 = vmatprep.subr.bf16.mxu0 %v4802_v6  ;;  %v1110_v7 = vpack.c.bf16 %v3549_v5, %v3548_v4 }
  0x8b   : > { %4215 = vmatpush3.bf16.msra.mxu0 %v4802_v6  ;;  %v1109_v6 = vpack.c.bf16 %v3547_v2, %v3546_v1 }
  0x8c   : > { %4224 = vmatprep.subr.bf16.mxu0 %v4803_v9 }
  0x8e   : > { %4217 = vmatmul.mubr.bf16.vlgmr.msra.gmra.mrb[0].mxu0 %v808_v12 }
  0x8f   : > { %4225 = vmatpush3.bf16.msra.mxu0 %v4803_v9  ;;  %4220 = vmatprep.mubr.bf16.mxu0 %v809_v14  ;;  %v3550_v9 = vld [vmem:[%s5117_s26 + $0x181] sm:$0xff]  ;;  %v4822_v14 = vld [vmem:[%s5974_s1 + $0x198] sm:$0xff]  }
  0x90   : > { %4226 = vmatprep.subr.bf16.mxu0 %v4804_v13  ;;  %v1111_v12 = vpack.c.bf16 %v3551_v10, %v3550_v9 }
  0x93   : > { %4227 = vmatpush3.bf16.msra.mxu0 %v4804_v13  ;;  %v1259_v13 = vpack.c.bf16 %v5172_v32, %v5150_v23  ;;  %v4825_v23 = vld [vmem:[%s5974_s1 + $0x1b0] sm:$0xff]   ;;  %v4826_v32 = vld [vmem:[%s5974_s1 + $0x1b8] sm:$0xff]  }
  0x94   : > { %4228 = vmatprep.subr.bf16.mxu0 %v4805_v17 }
  0x96   : > { %4221 = vmatmul.mubr.bf16.gmra.mrb[4].mxu0 %v810_v20  ;;  %v4828_v20 = vld [vmem:[%s5974_s1 + $0x1c8] sm:$0xff]  }
  0x97   : > { %4229 = vmatpush3.bf16.msra.mxu0 %v4805_v17  ;;  %4240 = vmatprep.mubr.bf16.mxu0 %v958_v22  ;;  %v4827_v17 = vld [vmem:[%s5974_s1 + $0x1c0] sm:$0xff]   ;;  %v4829_v22 = vld [vmem:[%s5974_s1 + $0x1d0] sm:$0xff]  }
  0x98   : > { %4230 = vmatprep.subr.bf16.mxu0 %v4806_v21 }
  0x9b   : > { %4231 = vmatpush3.bf16.msra.mxu0 %v4806_v21  ;;  %v3583_v21 = vld [vmem:[%s5117_s26 + $0x80] sm:$0xff] }
  0x9c   : > { %4232 = vmatprep.subr.bf16.mxu0 %v4807_v24  ;;  %v1262_v33 = vpack.c.bf16 %v3583_v21, %v5194_v40  ;;  %v4832_v40 = vld [vmem:[%s5974_s1 + $0x1e8] sm:$0xff]  }
  0x9f   : > { %4233 = vmatpush3.bf16.msra.mxu0 %v4807_v24  ;;  %v4924_v24 = vld [vmem:[%s5117_s26 + $0xb0] sm:$0xff] }
  0xa0   : > { %4234 = vmatprep.subr.bf16.mxu0 %v4808_v25  ;;  %v1410_v35 = vpack.c.bf16 %v4924_v24, %v4923_v34 }
  0xa3   : > { %4235 = vmatpush3.bf16.msra.mxu0 %v4808_v25  ;;  %v4831_v25 = vld [vmem:[%s5974_s1 + $0x1e0] sm:$0xff]  }
  0xa4   : > { %4236 = vmatprep.subr.bf16.mxu0 %v4809_v26 }
  0xa7   : > { %4237 = vmatpush3.bf16.msra.mxu0 %v4809_v26  ;;  %v4833_v26 = vld [vmem:[%s5974_s1 + $0x1f0] sm:$0xff]  }
  0xa8   : > { %4238 = vmatprep.subr.bf16.mxu0 %v4810_v27 }
  0xab   : > { %4239 = vmatpush3.bf16.msra.mxu0 %v4810_v27  ;;  %v4834_v27 = vld [vmem:[%s5974_s1 + $0x1f8] sm:$0xff]  }
  0xac   : > { %4248 = vmatprep.subr.bf16.mxu0 %v4811_v30 }
  0xae   : > { %4241 = vmatmul.mubr.bf16.vlgmr.msra.gmra.mrb[0].mxu0 %v959_v37  ;;  %v4928_v37 = vld [vmem:[%s5117_s26 + $0xf0] sm:$0xff] }
  0xaf   : > { %4249 = vmatpush3.bf16.msra.mxu0 %v4811_v30  ;;  %4244 = vmatprep.mubr.bf16.mxu0 %v960_v38  ;;  %v4926_v30 = vld [vmem:[%s5117_s26 + $0xd0] sm:$0xff]  ;;  %v1412_v38 = vpack.c.bf16 %v4928_v37, %v4927_v36  ;;  %v1774_v36 = vld [vmem:[#allocation2] sm:$0xff] }
  0xb0   : > { %4250 = vmatprep.subr.bf16.mxu0 %v4812_v41  ;;  %v1411_v31 = vpack.c.bf16 %v4926_v30, %v4925_v29  ;;  %v4853_v30 = vld [vmem:[%s5975_s2 + $0x10] sm:$0xff]  }
  0xb3   : > { %4251 = vmatpush3.bf16.msra.mxu0 %v4812_v41  ;;  %v4836_v41 = vld [vmem:[%s5974_s1 + $0x208] sm:$0xff]  }
  0xb4   : > { %4252 = vmatprep.subr.bf16.mxu0 %v4813_v45 }
  0xb6   : > { %4245 = vmatmul.mubr.bf16.gmra.mrb[4].mxu0 %v961_v48  ;;  %v4838_v48 = vld [vmem:[%s5974_s1 + $0x218] sm:$0xff]  }
  0xb7   : > { %4253 = vmatpush3.bf16.msra.mxu0 %v4813_v45  ;;  %4264 = vmatprep.mubr.bf16.mxu0 %v1108_v49  ;;  %v4929_v45 = vld [vmem:[%s5117_s26 + $0x100] sm:$0xff] }
  0xb8   : > { %4254 = vmatprep.subr.bf16.mxu0 %v4814_v50  ;;  %v1413_v46 = vpack.c.bf16 %v3615_v42, %v4929_v45  ;;  %v4839_v49 = vld [vmem:[%s5974_s1 + $0x220] sm:$0xff]  }
  0xbb   : > { %4255 = vmatpush3.bf16.msra.mxu0 %v4814_v50  ;;  %v4842_v50 = vld [vmem:[%s5974_s1 + $0x238] sm:$0xff]  }
  0xbc   : > { %4256 = vmatprep.subr.bf16.mxu0 %v4815_v57 }
  0xbf   : > { %4257 = vmatpush3.bf16.msra.mxu0 %v4815_v57  ;;  %v3647_v57 = vld [vmem:[%s5117_s26 + $0x81] sm:$0xff] }
  0xc0   : > { %4258 = vmatprep.subr.bf16.mxu0 %v4816_v61  ;;  %v1563_v58 = vpack.c.bf16 %v3647_v57, %v5247_v60  ;;  %v4851_v60 = vld [vmem:[%s5975_s2] sm:$0xff]  }
  0xc3   : > { %4259 = vmatpush3.bf16.msra.mxu0 %v4816_v61  ;;  %v4847_v61 = vld [vmem:[%s5975_s2 + $0x60] sm:$0xff]  }
  0xc4   : > { %4260 = vmatprep.subr.bf16.mxu0 %v4817_v63  ;;  %4352 = vmatprep.subr.bf16.mxu1 %v4847_v61 }
  0xc5   : > { %4353 = vmatpush3.bf16.msra.mxu1 %v4847_v61  ;;  %v4856_v61 = vld [vmem:[%s5975_s2 + $0x28] sm:$0xff]  }
  0xc6   : > { %4354 = vmatprep.subr.bf16.mxu1 %v4848_v52 }
  0xc7   : > { %4261 = vmatpush3.bf16.msra.mxu0 %v4817_v63 }
  0xc8   : > { %4262 = vmatprep.subr.bf16.mxu0 %v4818_v0 }
  0xc9   : > { %4355 = vmatpush3.bf16.msra.mxu1 %v4848_v52 }
  0xca   : > { %4356 = vmatprep.subr.bf16.mxu1 %v4849_v55 }
  0xcb   : > { %4263 = vmatpush3.bf16.msra.mxu0 %v4818_v0  ;;  %v3673_v0 = vld [vmem:[%s5978_s5] ss:$0 sm:$0xff] }
  0xcc   : > { %4272 = vmatprep.subr.bf16.mxu0 %v4819_v3 }
  0xcd   : > { %4357 = vmatpush3.bf16.msra.mxu1 %v4849_v55  ;;  %v4858_v55 = vld [vmem:[%s5975_s2 + $0x38] sm:$0xff]  }
  0xce   : > { %4265 = vmatmul.mubr.bf16.vlgmr.msra.gmra.mrb[0].mxu0 %v1109_v6  ;;  %4358 = vmatprep.subr.bf16.mxu1 %v4850_v59 }
  0xcf   : > { %4273 = vmatpush3.bf16.msra.mxu0 %v4819_v3  ;;  %4268 = vmatprep.mubr.bf16.mxu0 %v1110_v7 }
  0xd0   : > { %4274 = vmatprep.subr.bf16.mxu0 %v4820_v8 }
  0xd1   : > { %4359 = vmatpush3.bf16.msra.mxu1 %v4850_v59  ;;  %v4859_v59 = vld [vmem:[%s5975_s2 + $0x80] sm:$0xff]  }
  0xd2   : > { %4368 = vmatprep.subr.bf16.mxu1 %v4851_v60 }
  0xd3   : > { %4275 = vmatpush3.bf16.msra.mxu0 %v4820_v8 }
  0xd4   : > { %4276 = vmatprep.subr.bf16.mxu0 %v4821_v11 }
  0xd6   : > { %4269 = vmatmul.mubr.bf16.gmra.mrb[4].mxu0 %v1111_v12  ;;  %v1802_v12 = vld [vmem:[#allocation2 + $0x1] sm:$0xff] }
  0xd7   : > { %4277 = vmatpush3.bf16.msra.mxu0 %v4821_v11  ;;  %4288 = vmatprep.mubr.bf16.mxu0 %v1259_v13 }
  0xd8   : > { %4278 = vmatprep.subr.bf16.mxu0 %v4822_v14 }
  0xdb   : > { %4279 = vmatpush3.bf16.msra.mxu0 %v4822_v14 }
  0xdc   : > { %4280 = vmatprep.subr.bf16.mxu0 %v4823_v15 }
  0xdf   : > { %4281 = vmatpush3.bf16.msra.mxu0 %v4823_v15 }
  0xe0   : > { %4282 = vmatprep.subr.bf16.mxu0 %v4824_v16 }
  0xe3   : > { %4283 = vmatpush3.bf16.msra.mxu0 %v4824_v16 }
  0xe4   : > { %4284 = vmatprep.subr.bf16.mxu0 %v4825_v23 }
  0xe7   : > { %4285 = vmatpush3.bf16.msra.mxu0 %v4825_v23 }
  0xe8   : > { %4286 = vmatprep.subr.bf16.mxu0 %v4826_v32 }
  0xeb   : > { %4287 = vmatpush3.bf16.msra.mxu0 %v4826_v32 }
  0xec   : > { %4296 = vmatprep.subr.bf16.mxu0 %v4827_v17 }
  0xee   : > { %4289 = vmatmul.mubr.bf16.vlgmr.msra.gmra.mrb[0].mxu0 %v1260_v18 }
  0xef   : > { %4297 = vmatpush3.bf16.msra.mxu0 %v4827_v17  ;;  %4292 = vmatprep.mubr.bf16.mxu0 %v1261_v19 }
  0xf0   : > { %4298 = vmatprep.subr.bf16.mxu0 %v4828_v20 }
  0xf3   : > { %4299 = vmatpush3.bf16.msra.mxu0 %v4828_v20 }
  0xf4   : > { %4300 = vmatprep.subr.bf16.mxu0 %v4829_v22 }
  0xf6   : > { %4293 = vmatmul.mubr.bf16.gmra.mrb[4].mxu0 %v1262_v33  ;;  %v4852_v33 = vld [vmem:[%s5975_s2 + $0x8] sm:$0xff]  }
  0xf7   : > { %4301 = vmatpush3.bf16.msra.mxu0 %v4829_v22  ;;  %4312 = vmatprep.mubr.bf16.mxu0 %v1410_v35 }
  0xf8   : > { %4302 = vmatprep.subr.bf16.mxu0 %v4830_v39 }
  0xfb   : > { %4303 = vmatpush3.bf16.msra.mxu0 %v4830_v39 }
  0xfc   : > { %4304 = vmatprep.subr.bf16.mxu0 %v4831_v25 }
  0xff   : > { %4305 = vmatpush3.bf16.msra.mxu0 %v4831_v25 }
 0x100   : > { %4306 = vmatprep.subr.bf16.mxu0 %v4832_v40 }
 0x103   : > { %4307 = vmatpush3.bf16.msra.mxu0 %v4832_v40 }
 0x104   : > { %4308 = vmatprep.subr.bf16.mxu0 %v4833_v26 }
 0x107   : > { %4309 = vmatpush3.bf16.msra.mxu0 %v4833_v26 }
 0x108   : > { %4310 = vmatprep.subr.bf16.mxu0 %v4834_v27 }
 0x10b   : > { %4311 = vmatpush3.bf16.msra.mxu0 %v4834_v27 }
 0x10c   : > { %4320 = vmatprep.subr.bf16.mxu0 %v4835_v28 }
 0x10e   : > { %4313 = vmatmul.mubr.bf16.vlgmr.msra.gmra.mrb[0].mxu0 %v1411_v31 }
 0x10f   : > { %4321 = vmatpush3.bf16.msra.mxu0 %v4835_v28  ;;  %4316 = vmatprep.mubr.bf16.mxu0 %v1412_v38 }
 0x110   : > { %4322 = vmatprep.subr.bf16.mxu0 %v4836_v41 }
 0x113   : > { %4323 = vmatpush3.bf16.msra.mxu0 %v4836_v41 }
 0x114   : > { %4324 = vmatprep.subr.bf16.mxu0 %v4837_v44 }
 0x116   : > { %4317 = vmatmul.mubr.bf16.gmra.mrb[4].mxu0 %v1413_v46 }
 0x117   : > { %4325 = vmatpush3.bf16.msra.mxu0 %v4837_v44  ;;  %4336 = vmatprep.mubr.bf16.mxu0 %v1560_v47 }
 0x118   : > { %4326 = vmatprep.subr.bf16.mxu0 %v4838_v48 }
 0x11b   : > { %4327 = vmatpush3.bf16.msra.mxu0 %v4838_v48 }
 0x11c   : > { %4328 = vmatprep.subr.bf16.mxu0 %v4839_v49 }
 0x11f   : > { %4329 = vmatpush3.bf16.msra.mxu0 %v4839_v49  ;;  %v4854_v49 = vld [vmem:[%s5975_s2 + $0x18] sm:$0xff]  }
 0x120   : > { %4330 = vmatprep.subr.bf16.mxu0 %v4840_v43 }
 0x123   : > { %4331 = vmatpush3.bf16.msra.mxu0 %v4840_v43 }
 0x124   : > { %4332 = vmatprep.subr.bf16.mxu0 %v4841_v51 }
 0x127   : > { %4333 = vmatpush3.bf16.msra.mxu0 %v4841_v51 }
 0x128   : > { %4334 = vmatprep.subr.bf16.mxu0 %v4842_v50 }
 0x12b   : > { %4335 = vmatpush3.bf16.msra.mxu0 %v4842_v50 }
 0x12e   : > { %4337 = vmatmul.mubr.bf16.vlgmr.msra.gmra.mrb[0].mxu0 %v1561_v53 }
 0x12f   : > { %4340 = vmatprep.mubr.bf16.mxu0 %v1562_v56  ;;  %v4855_v56 = vld [vmem:[%s5975_s2 + $0x20] sm:$0xff]  }
 0x136   : > { %4341 = vmatmul.mubr.bf16.gmra.mrb[4].mxu0 %v1563_v58 }
 0x201   : > { %v4338_v63 = vpop.f32.mrb[0].mxu0 }
 0x202   : > { %v1711_v1 = vmul.f32 %v4338_v63, %v3672_v62  ;;  %v1663_v2 = vpop.f32.mrb[1].mxu0 }
 0x203   : > { %v1709_v3 = vmul.f32 %v3672_v62, %v1663_v2  ;;  %v4339_v4 = vpop.f32.mrb[2].mxu0  ;;  %v4860_v2 = vld [vmem:[%s5975_s2 + $0x88] sm:$0xff]  }
 0x204   : > { %v1726_v5 = vadd.f32 %v3673_v0, %v1711_v1  ;;  %v1712_v6 = vmul.f32 %v4339_v4, %v3672_v62  ;;  %v1666_v7 = vpop.f32.mrb[3].mxu0  ;;  %v4861_v4 = vld [vmem:[%s5975_s2 + $0x90] sm:$0xff]  }
 0x205   : > { %v1724_v8 = vadd.f32 %v3673_v0, %v1709_v3  ;;  %v1710_v9 = vmul.f32 %v3672_v62, %v1666_v7 }
 0x206   : > { %v5470_v10 = vmax.f32 %v1726_v5, 0.0  ;;  %v1727_v11 = vadd.f32 %v3673_v0, %v1712_v6  ;;  %v2057_v6 = vld [vmem:[#allocation2 + $0x2] sm:$0xff] }
 0x207   : > { %v5472_v13 = vmax.f32 %v1724_v8, 0.0  ;;  %v1725_v14 = vadd.f32 %v3673_v0, %v1710_v9  ;;  %v4862_v9 = vld [vmem:[%s5975_s2 + $0x98] sm:$0xff]  }
 0x208   : > { %1768 = vst [vmem:[#allocation2 + $0x31] sm:$0xff] %v5470_v10  ;;  %v5475_v15 = vmax.f32 %v1727_v11, 0.0 }
 0x209   : > { %1766 = vst [vmem:[#allocation2 + $0x11] sm:$0xff] %v5472_v13  ;;  %v5478_v16 = vmax.f32 %v1725_v14, 0.0  ;;  %v4342_v23 = vpop.f32.mrb[4].mxu0  ;;  %v1810_v32 = vpack.c.bf16 %v5472_v13, %v1802_v12  ;;  %v4863_v12 = vld [vmem:[%s5975_s2 + $0xa0] sm:$0xff]   ;;  %v4864_v14 = vld [vmem:[%s5975_s2 + $0xa8] sm:$0xff]  }
 0x20a   : > { %1769 = vst [vmem:[#allocation2 + $0x41] sm:$0xff] %v5475_v15  ;;  %v1715_v17 = vmul.f32 %v4342_v23, %v3672_v62  ;;  %v1679_v18 = vpop.f32.mrb[5].mxu0  ;;  %v2366_v19 = vpack.c.bf16 %v5475_v15, %v5470_v10  ;;  %v4865_v23 = vld [vmem:[%s5975_s2 + $0xb0] sm:$0xff]  }
 0x20b   : > { %1767 = vst [vmem:[#allocation2 + $0x21] sm:$0xff] %v5478_v16  ;;  %v1713_v20 = vmul.f32 %v3672_v62, %v1679_v18  ;;  %v4343_v21 = vpop.f32.mrb[6].mxu0  ;;  %4360 = vmatprep.mubr.bf16.mxu1 %v1810_v32  ;;  %v5487_v22 = vpack.c.bf16 %v5470_v10, %v5478_v16  ;;  %v2365_v34 = vpack.c.bf16 %v5478_v16, %v5472_v13  ;;  %v4866_v32 = vld [vmem:[%s5975_s2 + $0xb8] sm:$0xff]   ;;  %v4880_v13 = vld [vmem:[%s5975_s2 + $0x128] sm:$0xff]   ;;  %v5711_v16 = vld [vmem:[%s5976_s3 + $0x20] sm:$0xff]  }
 0x20c   : > { %v1730_v24 = vadd.f32 %v3673_v0, %v1715_v17  ;;  %v1716_v35 = vmul.f32 %v4343_v21, %v3672_v62  ;;  %v1682_v39 = vpop.f32.mrb[7].mxu0  ;;  %v4867_v17 = vld [vmem:[%s5975_s2 + $0xc0] sm:$0xff]  }
 0x20d   : > { %v1728_v25 = vadd.f32 %v3673_v0, %v1713_v20  ;;  %v1714_v40 = vmul.f32 %v3672_v62, %v1682_v39  ;;  %4361 = vmatmul.mubr.bf16.vlgmr.msra.gmra.mrb[0].mxu1 %v5487_v22  ;;  %v4868_v20 = vld [vmem:[%s5975_s2 + $0xc8] sm:$0xff]   ;;  %v4870_v39 = vld [vmem:[%s5975_s2 + $0xd8] sm:$0xff]   ;;  %v4887_v10 = vld [vmem:[%s5975_s2 + $0x160] sm:$0xff]  }
 0x20e   : > { %v5495_v26 = vmax.f32 %v1730_v24, 0.0  ;;  %v1731_v27 = vadd.f32 %v3673_v0, %v1716_v35  ;;  %4369 = vmatpush3.bf16.msra.mxu1 %v4851_v60 }
 0x20f   : > { %v5497_v28 = vmax.f32 %v1728_v25, 0.0  ;;  %v1729_v29 = vadd.f32 %v3673_v0, %v1714_v40  ;;  %4370 = vmatprep.subr.bf16.mxu1 %v4852_v33  ;;  %v5514_v42 = vld [vmem:[#allocation2 + $0x32] sm:$0xff]  ;;  %v4871_v40 = vld [vmem:[%s5975_s2 + $0xe0] sm:$0xff]  }
 0x210   : > { %1772 = vst [vmem:[#allocation2 + $0x71] sm:$0xff] %v5495_v26  ;;  %v5503_v31 = vmax.f32 %v1731_v27, 0.0  ;;  %v5512_v41 = vld [vmem:[#allocation2 + $0x10] sm:$0xff]  ;;  %v4872_v27 = vld [vmem:[%s5975_s2 + $0xe8] sm:$0xff]  }
 0x211   : > { %1770 = vst [vmem:[#allocation2 + $0x51] sm:$0xff] %v5497_v28  ;;  %v5506_v37 = vmax.f32 %v1729_v29, 0.0  ;;  %v5510_v38 = vpack.c.bf16 %v5497_v28, %v5475_v15  ;;  %v5516_v44 = vld [vmem:[#allocation2 + $0x42] sm:$0xff]  ;;  %v5534_v43 = vld [vmem:[#allocation2 + $0x12] sm:$0xff]  ;;  %v1782_v51 = vpack.c.bf16 %v5512_v41, %v1774_v36 }
 0x212   : > { %1773 = vst [vmem:[#allocation2 + $0x81] sm:$0xff] %v5503_v31  ;;  %4371 = vmatpush3.bf16.msra.mxu1 %v4852_v33  ;;  %v5519_v45 = vld [vmem:[#allocation2 + $0x22] sm:$0xff]  ;;  %v2368_v46 = vpack.c.bf16 %v5503_v31, %v5495_v26  ;;  %v2516_v47 = vpack.c.bf16 %v5516_v44, %v5514_v42  ;;  %v5565_v63 = vld [vmem:[#allocation2 + $0x30] sm:$0xff]  ;;  %v2065_v11 = vpack.c.bf16 %v5534_v43, %v2057_v6 }
 0x213   : > { %1771 = vst [vmem:[#allocation2 + $0x61] sm:$0xff] %v5506_v37  ;;  %4364 = vmatprep.mubr.bf16.mxu1 %v5510_v38  ;;  %4372 = vmatprep.subr.bf16.mxu1 %v4853_v30  ;;  %v5529_v48 = vpack.c.bf16 %v5495_v26, %v5506_v37  ;;  %v2367_v50 = vpack.c.bf16 %v5506_v37, %v5497_v28  ;;  %v1776_v60 = vld [vmem:[#allocation2 + $0x20] sm:$0xff]  ;;  %v4869_v33 = vld [vmem:[%s5975_s2 + $0xd0] sm:$0xff]   ;;  %v4888_v15 = vld [vmem:[%s5975_s2 + $0x168] sm:$0xff]  }
 0x214   : > { %v2515_v53 = vpack.c.bf16 %v5519_v45, %v5534_v43  ;;  %v5568_v0 = vpack.c.bf16 %v5565_v63, %v1776_v60  ;;  %v5570_v1 = vld [vmem:[#allocation2 + $0x40] sm:$0xff]  ;;  %v5614_v18 = vpack.c.bf16 %v5514_v42, %v5519_v45  ;;  %v2215_v25 = vpack.c.bf16 %v1776_v60, %v5512_v41  ;;  %v4873_v29 = vld [vmem:[%s5975_s2 + $0xf0] sm:$0xff]   ;;  %v4878_v60 = vld [vmem:[%s5975_s2 + $0x118] sm:$0xff]  }
 0x215   : > { %4365 = vmatmul.mubr.bf16.gmra.mrb[4].mxu1 %v5529_v48  ;;  %v4875_v36 = vld [vmem:[%s5975_s2 + $0x100] sm:$0xff]   ;;  %v2216_v41 = vpack.c.bf16 %v5570_v1, %v5565_v63  ;;  %v4890_v26 = vld [vmem:[%s5975_s2 + $0x178] sm:$0xff]   ;;  %v4892_v37 = vld [vmem:[%s5975_s2 + $0x188] sm:$0xff]  }
 0x216   : > { %4373 = vmatpush3.bf16.msra.mxu1 %v4853_v30  ;;  %4384 = vmatprep.mubr.bf16.mxu1 %v1782_v51  ;;  %v4874_v30 = vld [vmem:[%s5975_s2 + $0xf8] sm:$0xff]   ;;  %v5662_v51 = vld [vmem:[%s5976_s3] sm:$0xff]   ;;  %v4893_v45 = vld [vmem:[%s5975_s2 + $0x190] sm:$0xff]  }
 0x217   : > { %4374 = vmatprep.subr.bf16.mxu1 %v4854_v49  ;;  %v5586_v7 = vld [vmem:[#allocation2 + $0x70] sm:$0xff]  ;;  %4560 = vmatprep.subr.bf16.mxu0 %v5662_v51  ;;  %v4879_v63 = vld [vmem:[%s5975_s2 + $0x120] sm:$0xff]   ;;  %v4894_v42 = vld [vmem:[%s5975_s2 + $0x198] sm:$0xff]  }
 0x218   : > { %v5545_v57 = vld [vmem:[#allocation2 + $0x52] sm:$0xff]  ;;  %4561 = vmatpush3.bf16.msra.mxu0 %v5662_v51  ;;  %v4883_v6 = vld [vmem:[%s5975_s2 + $0x140] sm:$0xff]  }
 0x219   : > { %v5563_v62 = vld [vmem:[#allocation2 + $0x50] sm:$0xff]  ;;  %v5621_v21 = vpack.c.bf16 %v5545_v57, %v5516_v44  ;;  %v4891_v28 = vld [vmem:[%s5975_s2 + $0x180] sm:$0xff]  }
 0x21a   : > { %4375 = vmatpush3.bf16.msra.mxu1 %v4854_v49  ;;  %v5547_v58 = vld [vmem:[#allocation2 + $0x62] sm:$0xff]  ;;  %v5577_v3 = vpack.c.bf16 %v5563_v62, %v5570_v1  ;;  %v5628_v24 = vld [vmem:[#allocation2 + $0x72] sm:$0xff] }
 0x21b   : > { %4376 = vmatprep.subr.bf16.mxu1 %v4855_v56  ;;  %v2517_v52 = vpack.c.bf16 %v5547_v58, %v5545_v57  ;;  %v5584_v5 = vld [vmem:[#allocation2 + $0x60] sm:$0xff]  ;;  %v5632_v35 = vpack.c.bf16 %v5628_v24, %v5547_v58  ;;  %v4876_v49 = vld [vmem:[%s5975_s2 + $0x108] sm:$0xff]   ;;  %v5701_v1 = vld [vmem:[%s5976_s3 + $0x18] sm:$0xff]  }
 0x21c   : > { %v5590_v8 = vpack.c.bf16 %v5586_v7, %v5584_v5  ;;  %v4895_v44 = vld [vmem:[%s5975_s2 + $0x1a0] sm:$0xff]   ;;  %v4900_v58 = vld [vmem:[%s5975_s2 + $0x1c8] sm:$0xff]  }
 0x21d   : > { %v4899_v57 = vld [vmem:[%s5975_s2 + $0x1c0] sm:$0xff]  }
 0x21e   : > { %4377 = vmatpush3.bf16.msra.mxu1 %v4855_v56  ;;  %v2217_v56 = vpack.c.bf16 %v5584_v5, %v5563_v62  ;;  %v5688_v62 = vld [vmem:[%s5976_s3 + $0x10] sm:$0xff]  }
 0x21f   : > { %4378 = vmatprep.subr.bf16.mxu1 %v4856_v61  ;;  %v5731_v5 = vld [vmem:[%s5976_s3 + $0x30] sm:$0xff]  }
 0x222   : > { %4379 = vmatpush3.bf16.msra.mxu1 %v4856_v61  ;;  %v4877_v61 = vld [vmem:[%s5975_s2 + $0x110] sm:$0xff]  }
 0x223   : > { %4380 = vmatprep.subr.bf16.mxu1 %v4857_v54 }
 0x226   : > { %4381 = vmatpush3.bf16.msra.mxu1 %v4857_v54  ;;  %v5674_v54 = vld [vmem:[%s5976_s3 + $0x8] sm:$0xff]  }
 0x227   : > { %4382 = vmatprep.subr.bf16.mxu1 %v4858_v55  ;;  %4562 = vmatprep.subr.bf16.mxu0 %v5674_v54 }
 0x228   : > { %4563 = vmatpush3.bf16.msra.mxu0 %v5674_v54 }
 0x229   : > { %4564 = vmatprep.subr.bf16.mxu0 %v5688_v62 }
 0x22a   : > { %4383 = vmatpush3.bf16.msra.mxu1 %v4858_v55  ;;  %v5676_v55 = vld [vmem:[#allocation2 + $0x80] sm:$0xff] }
 0x22b   : > { %4392 = vmatprep.subr.bf16.mxu1 %v4859_v59 }
 0x22c   : > { %4565 = vmatpush3.bf16.msra.mxu0 %v5688_v62 }
 0x22d   : > { %4385 = vmatmul.mubr.bf16.vlgmr.msra.gmra.mrb[0].mxu1 %v5568_v0  ;;  %4566 = vmatprep.subr.bf16.mxu0 %v5701_v1 }
 0x22e   : > { %4388 = vmatprep.mubr.bf16.mxu1 %v5577_v3  ;;  %4393 = vmatpush3.bf16.msra.mxu1 %v4859_v59  ;;  %v2218_v59 = vpack.c.bf16 %v5676_v55, %v5586_v7  ;;  %v5741_v7 = vld [vmem:[%s5976_s3 + $0x38] sm:$0xff]  }
 0x22f   : > { %4394 = vmatprep.subr.bf16.mxu1 %v4860_v2 }
 0x230   : > { %4567 = vmatpush3.bf16.msra.mxu0 %v5701_v1 }
 0x231   : > { %4568 = vmatprep.subr.bf16.mxu0 %v5711_v16 }
 0x232   : > { %4395 = vmatpush3.bf16.msra.mxu1 %v4860_v2  ;;  %v5721_v2 = vld [vmem:[%s5976_s3 + $0x28] sm:$0xff]  }
 0x233   : > { %4396 = vmatprep.subr.bf16.mxu1 %v4861_v4 }
 0x234   : > { %4569 = vmatpush3.bf16.msra.mxu0 %v5711_v16 }
 0x235   : > { %4389 = vmatmul.mubr.bf16.gmra.mrb[4].mxu1 %v5590_v8  ;;  %4570 = vmatprep.subr.bf16.mxu0 %v5721_v2 }
 0x236   : > { %4397 = vmatpush3.bf16.msra.mxu1 %v4861_v4  ;;  %4408 = vmatprep.mubr.bf16.mxu1 %v2065_v11  ;;  %v4882_v4 = vld [vmem:[%s5975_s2 + $0x138] sm:$0xff]   ;;  %v3877_v11 = vld [vmem:[%s5117_s26 + $0x1c0] sm:$0xff] }
 0x237   : > { %4398 = vmatprep.subr.bf16.mxu1 %v4862_v9 }
 0x238   : > { %4571 = vmatpush3.bf16.msra.mxu0 %v5721_v2 }
 0x239   : > { %4572 = vmatprep.subr.bf16.mxu0 %v5731_v5 }
 0x23a   : > { %4399 = vmatpush3.bf16.msra.mxu1 %v4862_v9  ;;  %v3876_v9 = vld [vmem:[%s5117_s26 + $0x1b0] sm:$0xff] }
 0x23b   : > { %4400 = vmatprep.subr.bf16.mxu1 %v4863_v12 }
 0x23c   : > { %4573 = vmatpush3.bf16.msra.mxu0 %v5731_v5 }
 0x23d   : > { %4574 = vmatprep.subr.bf16.mxu0 %v5741_v7 }
 0x23e   : > { %4401 = vmatpush3.bf16.msra.mxu1 %v4863_v12  ;;  %v3146_v12 = vpack.c.bf16 %v3877_v11, %v3876_v9 }
 0x23f   : > { %4402 = vmatprep.subr.bf16.mxu1 %v4864_v14 }
 0x240   : > { %4575 = vmatpush3.bf16.msra.mxu0 %v5741_v7  ;;  %4576 = vmatprep.mubr.bf16.mxu0 %v3146_v12 }
 0x242   : > { %4403 = vmatpush3.bf16.msra.mxu1 %v4864_v14  ;;  %v3878_v14 = vld [vmem:[%s5117_s26 + $0x1d0] sm:$0xff] }
 0x243   : > { %4404 = vmatprep.subr.bf16.mxu1 %v4865_v23 }
 0x246   : > { %4405 = vmatpush3.bf16.msra.mxu1 %v4865_v23  ;;  %v3879_v23 = vld [vmem:[%s5117_s26 + $0x1e0] sm:$0xff] }
 0x247   : > { %4406 = vmatprep.subr.bf16.mxu1 %v4866_v32 }
 0x24a   : > { %4407 = vmatpush3.bf16.msra.mxu1 %v4866_v32  ;;  %v4884_v32 = vld [vmem:[%s5975_s2 + $0x148] sm:$0xff]  }
 0x24b   : > { %4416 = vmatprep.subr.bf16.mxu1 %v4867_v17 }
 0x24d   : > { %4409 = vmatmul.mubr.bf16.vlgmr.msra.gmra.mrb[0].mxu1 %v5614_v18 }
 0x24e   : > { %4412 = vmatprep.mubr.bf16.mxu1 %v5621_v21  ;;  %4417 = vmatpush3.bf16.msra.mxu1 %v4867_v17  ;;  %v3147_v17 = vpack.c.bf16 %v3879_v23, %v3878_v14 }
 0x24f   : > { %4418 = vmatprep.subr.bf16.mxu1 %v4868_v20 }
 0x250   : > { %4577 = vmatmul.mubr.bf16.vlgmr.msra.gmra.mrb[8].mxu0 %v3147_v17 }
 0x252   : > { %4419 = vmatpush3.bf16.msra.mxu1 %v4868_v20  ;;  %v4885_v20 = vld [vmem:[%s5975_s2 + $0x150] sm:$0xff]  }
 0x253   : > { %4420 = vmatprep.subr.bf16.mxu1 %v4869_v33 }
 0x255   : > { %4413 = vmatmul.mubr.bf16.gmra.mrb[4].mxu1 %v5632_v35 }
 0x256   : > { %4421 = vmatpush3.bf16.msra.mxu1 %v4869_v33  ;;  %4432 = vmatprep.mubr.bf16.mxu1 %v2215_v25  ;;  %v4886_v33 = vld [vmem:[%s5975_s2 + $0x158] sm:$0xff]   ;;  %v4905_v25 = vld [vmem:[%s5975_s2 + $0x1f0] sm:$0xff]  }
 0x257   : > { %4422 = vmatprep.subr.bf16.mxu1 %v4870_v39 }
 0x25a   : > { %4423 = vmatpush3.bf16.msra.mxu1 %v4870_v39  ;;  %v4902_v39 = vld [vmem:[%s5975_s2 + $0x1d8] sm:$0xff]  }
 0x25b   : > { %4424 = vmatprep.subr.bf16.mxu1 %v4871_v40 }
 0x25e   : > { %4425 = vmatpush3.bf16.msra.mxu1 %v4871_v40  ;;  %v4907_v40 = vld [vmem:[%s5975_s2 + $0x200] sm:$0xff]  }
 0x25f   : > { %4426 = vmatprep.subr.bf16.mxu1 %v4872_v27 }
 0x262   : > { %4427 = vmatpush3.bf16.msra.mxu1 %v4872_v27  ;;  %v4909_v27 = vld [vmem:[%s5975_s2 + $0x208] sm:$0xff]  }
 0x263   : > { %4428 = vmatprep.subr.bf16.mxu1 %v4873_v29 }
 0x266   : > { %4429 = vmatpush3.bf16.msra.mxu1 %v4873_v29  ;;  %v4911_v29 = vld [vmem:[%s5975_s2 + $0x210] sm:$0xff]  }
 0x267   : > { %4430 = vmatprep.subr.bf16.mxu1 %v4874_v30 }
 0x26a   : > { %4431 = vmatpush3.bf16.msra.mxu1 %v4874_v30  ;;  %v2815_v30 = vld [vmem:[#allocation2 + $0x91] sm:$0xff] }
 0x26b   : > { %4440 = vmatprep.subr.bf16.mxu1 %v4875_v36 }
 0x26d   : > { %4433 = vmatmul.mubr.bf16.vlgmr.msra.gmra.mrb[0].mxu1 %v2216_v41  ;;  %v4913_v41 = vld [vmem:[%s5975_s2 + $0x218] sm:$0xff]  }
 0x26e   : > { %4436 = vmatprep.mubr.bf16.mxu1 %v2217_v56  ;;  %4441 = vmatpush3.bf16.msra.mxu1 %v4875_v36  ;;  %v2819_v36 = vpack.c.bf16 %v2815_v30, %v5503_v31  ;;  %v4917_v31 = vld [vmem:[%s5975_s2 + $0x228] sm:$0xff]   ;;  %v3881_v56 = vld [vmem:[%s5117_s26 + $0x200] sm:$0xff] }
 0x26f   : > { %4442 = vmatprep.subr.bf16.mxu1 %v4876_v49 }
 0x272   : > { %4443 = vmatpush3.bf16.msra.mxu1 %v4876_v49  ;;  %v3880_v49 = vld [vmem:[%s5117_s26 + $0x1f0] sm:$0xff] }
 0x273   : > { %4444 = vmatprep.subr.bf16.mxu1 %v4877_v61 }
 0x275   : > { %4437 = vmatmul.mubr.bf16.gmra.mrb[4].mxu1 %v2218_v59 }
 0x276   : > { %4445 = vmatpush3.bf16.msra.mxu1 %v4877_v61  ;;  %4456 = vmatprep.mubr.bf16.mxu1 %v2365_v34  ;;  %v4881_v34 = vld [vmem:[%s5975_s2 + $0x130] sm:$0xff]  }
 0x277   : > { %4446 = vmatprep.subr.bf16.mxu1 %v4878_v60  ;;  %v2965_v61 = vld [vmem:[#allocation2 + $0x92] sm:$0xff] }
 0x27a   : > { %4447 = vmatpush3.bf16.msra.mxu1 %v4878_v60 }
 0x27b   : > { %4448 = vmatprep.subr.bf16.mxu1 %v4879_v63 }
 0x27e   : > { %4449 = vmatpush3.bf16.msra.mxu1 %v4879_v63 }
 0x27f   : > { %4450 = vmatprep.subr.bf16.mxu1 %v4880_v13 }
 0x282   : > { %4451 = vmatpush3.bf16.msra.mxu1 %v4880_v13 }
 0x283   : > { %4452 = vmatprep.subr.bf16.mxu1 %v4881_v34 }
 0x286   : > { %4453 = vmatpush3.bf16.msra.mxu1 %v4881_v34  ;;  %v3893_v34 = vld [vmem:[%s5982_s9] ss:$0 sm:$0xff] }
 0x287   : > { %4454 = vmatprep.subr.bf16.mxu1 %v4882_v4 }
 0x28a   : > { %4455 = vmatpush3.bf16.msra.mxu1 %v4882_v4 }
 0x28b   : > { %4464 = vmatprep.subr.bf16.mxu1 %v4883_v6 }
 0x28d   : > { %4457 = vmatmul.mubr.bf16.vlgmr.msra.gmra.mrb[0].mxu1 %v2366_v19  ;;  %v4889_v19 = vld [vmem:[%s5975_s2 + $0x170] sm:$0xff]  }
 0x28e   : > { %4460 = vmatprep.mubr.bf16.mxu1 %v2367_v50  ;;  %4465 = vmatpush3.bf16.msra.mxu1 %v4883_v6  ;;  %v4897_v50 = vld [vmem:[%s5975_s2 + $0x1b0] sm:$0xff]   ;;  %v3875_v6 = vld [vmem:[%s5980_s7] ss:$0 sm:$0xff] }
 0x28f   : > { %4466 = vmatprep.subr.bf16.mxu1 %v4884_v32 }
 0x292   : > { %4467 = vmatpush3.bf16.msra.mxu1 %v4884_v32 }
 0x293   : > { %4468 = vmatprep.subr.bf16.mxu1 %v4885_v20 }
 0x295   : > { %4461 = vmatmul.mubr.bf16.gmra.mrb[4].mxu1 %v2368_v46  ;;  %v5797_v46 = vld [vmem:[#allocation2 + $0x82] sm:$0xff] }
 0x296   : > { %4469 = vmatpush3.bf16.msra.mxu1 %v4885_v20  ;;  %4480 = vmatprep.mubr.bf16.mxu1 %v2515_v53  ;;  %v2518_v43 = vpack.c.bf16 %v5797_v46, %v5628_v24  ;;  %v4898_v53 = vld [vmem:[%s5975_s2 + $0x1b8] sm:$0xff]   ;;  %v2969_v59 = vpack.c.bf16 %v2965_v61, %v5797_v46 }
 0x297   : > { %4470 = vmatprep.subr.bf16.mxu1 %v4886_v33 }
 0x29a   : > { %4471 = vmatpush3.bf16.msra.mxu1 %v4886_v33 }
 0x29b   : > { %4472 = vmatprep.subr.bf16.mxu1 %v4887_v10 }
 0x29e   : > { %4473 = vmatpush3.bf16.msra.mxu1 %v4887_v10 }
 0x29f   : > { %4474 = vmatprep.subr.bf16.mxu1 %v4888_v15 }
 0x2a2   : > { %4475 = vmatpush3.bf16.msra.mxu1 %v4888_v15 }
 0x2a3   : > { %4476 = vmatprep.subr.bf16.mxu1 %v4889_v19 }
 0x2a6   : > { %4477 = vmatpush3.bf16.msra.mxu1 %v4889_v19 }
 0x2a7   : > { %4478 = vmatprep.subr.bf16.mxu1 %v4890_v26 }
 0x2aa   : > { %4479 = vmatpush3.bf16.msra.mxu1 %v4890_v26 }
 0x2ab   : > { %4488 = vmatprep.subr.bf16.mxu1 %v4891_v28 }
 0x2ad   : > { %4481 = vmatmul.mubr.bf16.vlgmr.msra.gmra.mrb[0].mxu1 %v2516_v47  ;;  %v4896_v47 = vld [vmem:[%s5975_s2 + $0x1a8] sm:$0xff]  }
 0x2ae   : > { %4484 = vmatprep.mubr.bf16.mxu1 %v2517_v52  ;;  %4489 = vmatpush3.bf16.msra.mxu1 %v4891_v28  ;;  %v4901_v52 = vld [vmem:[%s5975_s2 + $0x1d0] sm:$0xff]  }
 0x2af   : > { %4490 = vmatprep.subr.bf16.mxu1 %v4892_v37 }
 0x2b2   : > { %4491 = vmatpush3.bf16.msra.mxu1 %v4892_v37 }
 0x2b3   : > { %4492 = vmatprep.subr.bf16.mxu1 %v4893_v45 }
 0x2b5   : > { %4485 = vmatmul.mubr.bf16.gmra.mrb[4].mxu1 %v2518_v43 }
 0x2b6   : > { %4493 = vmatpush3.bf16.msra.mxu1 %v4893_v45  ;;  %4504 = vmatprep.mubr.bf16.mxu1 %v5568_v0  ;;  %v2665_v0 = vld [vmem:[#allocation2 + $0x90] sm:$0xff] }
 0x2b7   : > { %4494 = vmatprep.subr.bf16.mxu1 %v4894_v42  ;;  %v2669_v24 = vpack.c.bf16 %v2665_v0, %v5676_v55  ;;  %v3148_v55 = vpack.c.bf16 %v3881_v56, %v3880_v49 }
 0x2ba   : > { %4495 = vmatpush3.bf16.msra.mxu1 %v4894_v42 }
 0x2bb   : > { %4496 = vmatprep.subr.bf16.mxu1 %v4895_v44 }
 0x2be   : > { %4497 = vmatpush3.bf16.msra.mxu1 %v4895_v44 }
 0x2bf   : > { %4498 = vmatprep.subr.bf16.mxu1 %v4896_v47 }
 0x2c2   : > { %4499 = vmatpush3.bf16.msra.mxu1 %v4896_v47 }
 0x2c3   : > { %4500 = vmatprep.subr.bf16.mxu1 %v4897_v50 }
 0x2c6   : > { %4501 = vmatpush3.bf16.msra.mxu1 %v4897_v50 }
 0x2c7   : > { %4502 = vmatprep.subr.bf16.mxu1 %v4898_v53 }
 0x2ca   : > { %4503 = vmatpush3.bf16.msra.mxu1 %v4898_v53 }
 0x2cb   : > { %4512 = vmatprep.subr.bf16.mxu1 %v4899_v57 }
 0x2cd   : > { %4505 = vmatmul.mubr.bf16.vlgmr.msra.gmra.mrb[0].mxu1 %v5577_v3  ;;  %v4903_v3 = vld [vmem:[%s5975_s2 + $0x1e0] sm:$0xff]  }
 0x2ce   : > { %4508 = vmatprep.mubr.bf16.mxu1 %v5590_v8  ;;  %4513 = vmatpush3.bf16.msra.mxu1 %v4899_v57  ;;  %v4904_v8 = vld [vmem:[%s5975_s2 + $0x1e8] sm:$0xff]  }
 0x2cf   : > { %4514 = vmatprep.subr.bf16.mxu1 %v4900_v58 }
 0x2d2   : > { %4515 = vmatpush3.bf16.msra.mxu1 %v4900_v58 }
 0x2d3   : > { %4516 = vmatprep.subr.bf16.mxu1 %v4901_v52 }
 0x2d5   : > { %4509 = vmatmul.mubr.bf16.gmra.mrb[4].mxu1 %v2669_v24 }
 0x2d6   : > { %4517 = vmatpush3.bf16.msra.mxu1 %v4901_v52  ;;  %4528 = vmatprep.mubr.bf16.mxu1 %v5487_v22  ;;  %v4906_v22 = vld [vmem:[%s5975_s2 + $0x1f8] sm:$0xff]  }
 0x2d7   : > { %4518 = vmatprep.subr.bf16.mxu1 %v4902_v39 }
 0x2da   : > { %4519 = vmatpush3.bf16.msra.mxu1 %v4902_v39 }
 0x2db   : > { %4520 = vmatprep.subr.bf16.mxu1 %v4903_v3 }
 0x2de   : > { %4521 = vmatpush3.bf16.msra.mxu1 %v4903_v3 }
 0x2df   : > { %4522 = vmatprep.subr.bf16.mxu1 %v4904_v8 }
 0x2e2   : > { %4523 = vmatpush3.bf16.msra.mxu1 %v4904_v8 }
 0x2e3   : > { %4524 = vmatprep.subr.bf16.mxu1 %v4905_v25 }
 0x2e6   : > { %4525 = vmatpush3.bf16.msra.mxu1 %v4905_v25 }
 0x2e7   : > { %4526 = vmatprep.subr.bf16.mxu1 %v4906_v22 }
 0x2ea   : > { %4527 = vmatpush3.bf16.msra.mxu1 %v4906_v22 }
 0x2eb   : > { %4536 = vmatprep.subr.bf16.mxu1 %v4907_v40 }
 0x2ed   : > { %4529 = vmatmul.mubr.bf16.vlgmr.msra.gmra.mrb[0].mxu1 %v5510_v38  ;;  %v4915_v38 = vld [vmem:[%s5975_s2 + $0x220] sm:$0xff]  }
 0x2ee   : > { %4532 = vmatprep.mubr.bf16.mxu1 %v5529_v48  ;;  %4537 = vmatpush3.bf16.msra.mxu1 %v4907_v40  ;;  %v4919_v48 = vld [vmem:[%s5975_s2 + $0x230] sm:$0xff]  }
 0x2ef   : > { %4538 = vmatprep.subr.bf16.mxu1 %v4909_v27 }
 0x2f2   : > { %4539 = vmatpush3.bf16.msra.mxu1 %v4909_v27 }
 0x2f3   : > { %4540 = vmatprep.subr.bf16.mxu1 %v4911_v29 }
 0x2f5   : > { %4533 = vmatmul.mubr.bf16.gmra.mrb[4].mxu1 %v2819_v36 }
 0x2f6   : > { %4541 = vmatpush3.bf16.msra.mxu1 %v4911_v29  ;;  %4552 = vmatprep.mubr.bf16.mxu1 %v5614_v18  ;;  %v4921_v18 = vld [vmem:[%s5975_s2 + $0x238] sm:$0xff]  }
 0x2f7   : > { %4542 = vmatprep.subr.bf16.mxu1 %v4913_v41 }
 0x2fa   : > { %4543 = vmatpush3.bf16.msra.mxu1 %v4913_v41 }
 0x2fb   : > { %4544 = vmatprep.subr.bf16.mxu1 %v4915_v38 }
 0x2fe   : > { %4545 = vmatpush3.bf16.msra.mxu1 %v4915_v38 }
 0x2ff   : > { %4546 = vmatprep.subr.bf16.mxu1 %v4917_v31 }
 0x302   : > { %4547 = vmatpush3.bf16.msra.mxu1 %v4917_v31 }
 0x303   : > { %4548 = vmatprep.subr.bf16.mxu1 %v4919_v48 }
 0x306   : > { %4549 = vmatpush3.bf16.msra.mxu1 %v4919_v48 }
 0x307   : > { %4550 = vmatprep.subr.bf16.mxu1 %v4921_v18 }
 0x30a   : > { %4551 = vmatpush3.bf16.msra.mxu1 %v4921_v18 }
 0x30b   : > { %4584 = vmatprep.subr.bf16.mxu1 %v5662_v51 }
 0x30d   : > { %4553 = vmatmul.mubr.bf16.vlgmr.msra.gmra.mrb[0].mxu1 %v5621_v21  ;;  %v3882_v21 = vld [vmem:[%s5117_s26 + $0x210] sm:$0xff] }
 0x30e   : > { %4556 = vmatprep.mubr.bf16.mxu1 %v5632_v35  ;;  %4592 = vmatpush3.bf16.msra.mxu1 %v5662_v51  ;;  %v3883_v35 = vld [vmem:[%s5117_s26 + $0x220] sm:$0xff]  ;;  %s5923_s26 = scalar_lea.hbm %s5983_s10, %s3899_s27 }
 0x30f   : > { %4585 = vmatprep.subr.bf16.mxu1 %v5674_v54  ;;  %v3149_v51 = vpack.c.bf16 %v3883_v35, %v3882_v21 }
 0x312   : > { %4593 = vmatpush3.bf16.msra.mxu1 %v5674_v54 }
 0x313   : > { %4586 = vmatprep.subr.bf16.mxu1 %v5688_v62 }
 0x315   : > { %4557 = vmatmul.mubr.bf16.gmra.mrb[4].mxu1 %v2969_v59 }
 0x316   : > { %4594 = vmatpush3.bf16.msra.mxu1 %v5688_v62  ;;  %4580 = vmatprep.mubr.bf16.mxu1 %v3148_v55 }
 0x317   : > { %4587 = vmatprep.subr.bf16.mxu1 %v5701_v1 }
 0x31a   : > { %4595 = vmatpush3.bf16.msra.mxu1 %v5701_v1  ;;  %v3892_v1 = vld [vmem:[%s5981_s8] ss:$0 sm:$0xff] }
 0x31b   : > { %4588 = vmatprep.subr.bf16.mxu1 %v5711_v16 }
 0x31e   : > { %4596 = vmatpush3.bf16.msra.mxu1 %v5711_v16  ;;  %v3874_v16 = vld [vmem:[%s5979_s6] ss:$0 sm:$0xff] }
 0x31f   : > { %4589 = vmatprep.subr.bf16.mxu1 %v5721_v2 }
 0x322   : > { %4597 = vmatpush3.bf16.msra.mxu1 %v5721_v2 }
 0x323   : > { %4590 = vmatprep.subr.bf16.mxu1 %v5731_v5  ;;  %v4578_v54 = vpop.f32.mrb[8].mxu0 }
 0x324   : > { %v3248_v60 = vpop.f32.mrb[9].mxu0  ;;  %v3288_v13 = vmul.f32 %v4578_v54, %v3892_v1 }
 0x325   : > { %v4579_v62 = vpop.f32.mrb[10].mxu0  ;;  %v3286_v2 = vmul.f32 %v3892_v1, %v3248_v60 }
 0x326   : > { %4598 = vmatpush3.bf16.msra.mxu1 %v5731_v5  ;;  %v3251_v63 = vpop.f32.mrb[11].mxu0  ;;  %v3289_v4 = vmul.f32 %v4579_v62, %v3892_v1  ;;  %v3303_v11 = vadd.f32 %v3893_v34, %v3288_v13 }
 0x327   : > { %4591 = vmatprep.subr.bf16.mxu1 %v5741_v7  ;;  %v3301_v23 = vadd.f32 %v3893_v34, %v3286_v2 }
 0x328   : > { %v3304_v33 = vadd.f32 %v3893_v34, %v3289_v4 }
 0x32a   : > { %4599 = vmatpush3.bf16.msra.mxu1 %v5741_v7  ;;  %v3287_v7 = vmul.f32 %v3892_v1, %v3251_v63 }
 0x32c   : > { %v3302_v26 = vadd.f32 %v3893_v34, %v3287_v7 }
 0x32d   : > { %4581 = vmatmul.mubr.bf16.vlgmr.msra.gmra.mrb[8].mxu1 %v3149_v51 }
 0x3e0   : > { %v4554_v5 = vpop.f32.mrb[0].mxu1 }
 0x3e1   : > { %v3117_v9 = vmul.f32 %v4554_v5, %v3874_v16  ;;  %v3069_v12 = vpop.f32.mrb[1].mxu1 }
 0x3e2   : > { %v3115_v14 = vmul.f32 %v3874_v16, %v3069_v12  ;;  %v4555_v32 = vpop.f32.mrb[2].mxu1 }
 0x3e3   : > { %v3132_v17 = vadd.f32 %v3875_v6, %v3117_v9  ;;  %v3118_v20 = vmul.f32 %v4555_v32, %v3874_v16  ;;  %v3072_v10 = vpop.f32.mrb[3].mxu1 }
 0x3e4   : > { %v3130_v15 = vadd.f32 %v3875_v6, %v3115_v14  ;;  %v3116_v19 = vmul.f32 %v3874_v16, %v3072_v10 }
 0x3e5   : > { %v3311_v28 = vadd.f32 %v3303_v11, %v3132_v17  ;;  %v3133_v37 = vadd.f32 %v3875_v6, %v3118_v20 }
 0x3e6   : > { %v3309_v45 = vadd.f32 %v3301_v23, %v3130_v15  ;;  %v3131_v46 = vadd.f32 %v3875_v6, %v3116_v19 }
 0x3e7   : > { %v3319_v43 = vmax.f32 %v3311_v28, 0.0  ;;  %v3312_v42 = vadd.f32 %v3304_v33, %v3133_v37 }
 0x3e8   : > { %v3317_v44 = vmax.f32 %v3309_v45, 0.0  ;;  %v3310_v47 = vadd.f32 %v3302_v26, %v3131_v46  ;;  %v4558_v50 = vpop.f32.mrb[4].mxu1 }
 0x3e9   : > { %3327 = vst [vmem:[%s5911_s25 + $0x10] sm:$0xff] %v3319_v43  ;;  %v3320_v53 = vmax.f32 %v3312_v42, 0.0  ;;  %v3085_v57 = vpop.f32.mrb[5].mxu1  ;;  %v3121_v24 = vmul.f32 %v4558_v50, %v3874_v16 }
 0x3ea   : > { %3325 = vst [vmem:[%s5911_s25] sm:$0xff] %v3317_v44  ;;  %v3318_v58 = vmax.f32 %v3310_v47, 0.0  ;;  %v4559_v52 = vpop.f32.mrb[6].mxu1  ;;  %v3119_v39 = vmul.f32 %v3874_v16, %v3085_v57 }
 0x3eb   : > { %3328 = vst [vmem:[%s5911_s25 + $0x18] sm:$0xff] %v3320_v53  ;;  %v3088_v0 = vpop.f32.mrb[7].mxu1  ;;  %v3122_v8 = vmul.f32 %v4559_v52, %v3874_v16  ;;  %v3136_v30 = vadd.f32 %v3875_v6, %v3121_v24 }
 0x3ec   : > { %3326 = vst [vmem:[%s5911_s25 + $0x8] sm:$0xff] %v3318_v58  ;;  %v3120_v40 = vmul.f32 %v3874_v16, %v3088_v0  ;;  %v3134_v31 = vadd.f32 %v3875_v6, %v3119_v39 }
 0x3ed   : > { %v3137_v49 = vadd.f32 %v3875_v6, %v3122_v8 }
 0x3ee   : > { %v3135_v55 = vadd.f32 %v3875_v6, %v3120_v40 }
 0x400   : > { %v4582_v3 = vpop.f32.mrb[8].mxu1 }
 0x401   : > { %v3292_v25 = vmul.f32 %v4582_v3, %v3892_v1  ;;  %v3264_v22 = vpop.f32.mrb[9].mxu1 }
 0x402   : > { %v3290_v27 = vmul.f32 %v3892_v1, %v3264_v22  ;;  %v4583_v29 = vpop.f32.mrb[10].mxu1 }
 0x403   : > { %v3307_v36 = vadd.f32 %v3893_v34, %v3292_v25  ;;  %v3293_v41 = vmul.f32 %v4583_v29, %v3892_v1  ;;  %v3267_v38 = vpop.f32.mrb[11].mxu1 }
 0x404   : > { %v3305_v48 = vadd.f32 %v3893_v34, %v3290_v27  ;;  %v3291_v18 = vmul.f32 %v3892_v1, %v3267_v38 }
 0x405   : > { %v3315_v56 = vadd.f32 %v3307_v36, %v3136_v30  ;;  %v3308_v61 = vadd.f32 %v3893_v34, %v3293_v41 }
 0x406   : > { %v3313_v59 = vadd.f32 %v3305_v48, %v3134_v31  ;;  %v3306_v21 = vadd.f32 %v3893_v34, %v3291_v18 }
 0x407   : > { %v3323_v35 = vmax.f32 %v3315_v56, 0.0  ;;  %v3316_v51 = vadd.f32 %v3308_v61, %v3137_v49 }
 0x408   : > { %v3321_v54 = vmax.f32 %v3313_v59, 0.0  ;;  %v3314_v60 = vadd.f32 %v3306_v21, %v3135_v55 }
 0x409   : > { %3331 = vst [vmem:[%s5911_s25 + $0x30] sm:$0xff] %v3323_v35  ;;  %v3324_v62 = vmax.f32 %v3316_v51, 0.0 }
 0x40a   : > { %3329 = vst [vmem:[%s5911_s25 + $0x20] sm:$0xff] %v3321_v54  ;;  %v3322_v63 = vmax.f32 %v3314_v60, 0.0 }
 0x40b   : > { %3332 = vst [vmem:[%s5911_s25 + $0x38] sm:$0xff] %v3324_v62 }
 0x40c   : > { %3330 = vst [vmem:[%s5911_s25 + $0x28] sm:$0xff] %v3322_v63 }
 0x40d   : > { %4943 = shalt.err (!%p4940_p3)
}
 0x40e   : > { %s4944_s20 = scalar_lea.hbm %s5923_s26, 1024  ;;  %s4948_s29 = scalar_lea.hbm %s5983_s10, 2048 }
 0x40f   : > { %p4945_p4 = scmp.ne.s32.totalorder %s5923_s26, %s4944_s20  ;;  %p4949_p9 = scmp.lt.u32.totalorder %s5923_s26, %s5983_s10 }
 0x410   : > { %p4950_p10 = scmp.lt.u32.totalorder %s4948_s29, %s4944_s20  ;;  %p4952_p12 = scmp.lt.u32.totalorder %s4944_s20, %s5923_s26 }
 0x411   : > { %p4946_p7 = pnand %p4945_p4, %p5091_p5 }
 0x412   : > { %p4951_p11 = por %p4950_p10, %p4949_p9 }
 0x413   : > { %p4947_p8 = pneg %p4946_p7 }
 0x414   : > { %p4953_p13 = por %p4952_p12, %p4951_p11 }
 0x416   : > { %p4954_p0 = pnand %p4953_p13, %p4947_p8 }
 0x418   : > { %4957 = shalt.err (!%p4954_p0)
}
 0x419   : > { %s4996_s11 = smov 128   ;;  %s4997_s18 = smov 8  }
 0x41a   : > { %4729 = dma.vmem_to_hbm [thread:$0]  (%p5091_p5), %s5925_s28, 1024, %s5923_s26, %s5932_s17, %s4996_s11, %s4996_s11, %s4997_s18  }
 0x41b PF: > { %p4735_p1 = scmp.ge.s32.totalorder %s4992_s16, 2  ;;  %s3362_s21 = sand.u32 1, %s4980_s13  }
 0x41c   : > { %s3363_s20 = scalar_lea.sflag [#allocation4], %s3362_s21 }
 0x41d   : > { %p4732_p2 = pnand %p4735_p1, %p5095_p6 }
 0x41f   : > { %4975 = dma.done.wait (!%p4732_p2), %s3363_s20, 1024  }
 0x420   : > { %4977 = vsyncadd (!%p4732_p2), %s3363_s20, 4294966272  ;;  %p20_p3 = scmp.ge.s32.totalorder %s5078_s19, 4   ;;  %s5986_s13 = smov %s4984_s14 }
 0x421   : > { %s5987_s14 = smov %s4988_s15  ;;  %s5988_s15 = smov %s5089_s22 }
 0x422   : > { %s5989_s16 = smov %s5078_s19  ;;  %22 = sbr.rel (!%p20_p3) target bundleno = 3 (0x3), region = 119 }
 0x429   :  { %3368 = vsyncpa [#allocation4], 1 }
 0x42a   :  { %3370 = vsyncpa [#allocation4 + $0x1], 1 }

</bundles_post_ra>
